<compile_context>
chip_gen: v5e
topology: v5e:2x2
jax: 0.10.0
libtpu: 0.0.40
codegen_flags: <defaults>
</compile_context>

<pallas_src>
import functools

import jax
import jax.numpy as jnp
from jax import lax
from jax.experimental import pallas as pl
from jax.experimental.pallas import tpu as pltpu

HIDDEN = 64
IN_DIM = 6


def ray_gate_kernel(x_ref, w0_ref, w1_ref, w2_ref, w3_ref, wo_ref,
                    gate_ref, imp_ref, *, n_valid, needs_mask):
    # MLP hot path: 5 MXU matmuls with f32 accumulation, ReLU on the VPU.
    h = jnp.dot(x_ref[...], w0_ref[...], preferred_element_type=jnp.float32)
    h = jnp.maximum(h, 0.0)
    h = jnp.dot(h, w1_ref[...], preferred_element_type=jnp.float32)
    h = jnp.maximum(h, 0.0)
    h = jnp.dot(h, w2_ref[...], preferred_element_type=jnp.float32)
    h = jnp.maximum(h, 0.0)
    h = jnp.dot(h, w3_ref[...], preferred_element_type=jnp.float32)
    h = jnp.maximum(h, 0.0)
    logits = jnp.dot(h, wo_ref[...], preferred_element_type=jnp.float32)

    # softmax over the out_dim axis (PyTorch dim=1); reciprocal runs on the EUP slot.
    m = jnp.max(logits, axis=-1, keepdims=True)
    e = jnp.exp(logits - m)
    denom = jnp.sum(e, axis=-1, keepdims=True)
    gate = e * pl.reciprocal(denom, approx=False)
    gate_ref[...] = gate.astype(gate_ref.dtype)

    # Per-tile partial importance sum (reduced across tiles in the wrapper).
    # Padded rows (from rounding N up to a tile multiple) are masked out.
    tile_n = x_ref.shape[0]
    if needs_mask:
        row0 = pl.program_id(0) * tile_n
        row_ids = lax.broadcasted_iota(jnp.int32, (tile_n, 1), 0) + row0
        gate_for_sum = jnp.where(row_ids < n_valid, gate, 0.0)
    else:
        gate_for_sum = gate

    imp_ref[...] = jnp.sum(gate_for_sum, axis=0, keepdims=True)[None].astype(imp_ref.dtype)


def ray_gate_forward(x, weights, *, tile_n=2048):
    """x: [N, 6] f32. weights: (w0,w1,w2,w3,wo) with shapes
    (6,64),(64,64),(64,64),(64,64),(64,out_dim). Returns (gate, importance, None)."""
    w0, w1, w2, w3, wo = weights
    n, in_dim = x.shape
    assert in_dim == IN_DIM
    assert tile_n % 8 == 0, "tile_n must be a multiple of 8 (sublane width)"
    out_dim = wo.shape[1]

    num_tiles = (n + tile_n - 1) // tile_n
    n_pad = num_tiles * tile_n
    x_p = jnp.pad(x, ((0, n_pad - n), (0, 0))) if n_pad != n else x

    kernel = functools.partial(ray_gate_kernel, n_valid=n, needs_mask=(n_pad != n))

    gate_p, imp_p = pl.pallas_call(
        kernel,
        out_shape=(
            jax.ShapeDtypeStruct((n_pad, out_dim), jnp.float32),
            jax.ShapeDtypeStruct((num_tiles, 1, out_dim), jnp.float32),
        ),
        grid_spec=pltpu.PrefetchScalarGridSpec(
            num_scalar_prefetch=0,
            grid=(num_tiles,),
            in_specs=[
                pl.BlockSpec((tile_n, IN_DIM), lambda i: (i, 0)),
                pl.BlockSpec((IN_DIM, HIDDEN), lambda i: (0, 0)),
                pl.BlockSpec((HIDDEN, HIDDEN), lambda i: (0, 0)),
                pl.BlockSpec((HIDDEN, HIDDEN), lambda i: (0, 0)),
                pl.BlockSpec((HIDDEN, HIDDEN), lambda i: (0, 0)),
                pl.BlockSpec((HIDDEN, out_dim), lambda i: (0, 0)),
            ],
            out_specs=[
                pl.BlockSpec((tile_n, out_dim), lambda i: (i, 0)),
                pl.BlockSpec((1, 1, out_dim), lambda i: (i, 0, 0)),
            ],
        ),
        compiler_params=pltpu.CompilerParams(
            # No cross-iteration state: every grid step writes disjoint output
            # blocks, so the row-tile axis is safe to shard across TensorCores.
            dimension_semantics=("parallel",),
        ),
    )(x_p, w0, w1, w2, w3, wo)

    gate = gate_p[:n] if n_pad != n else gate_p
    importance = jnp.sum(imp_p, axis=(0, 1))           # [out_dim]
    top_k_indices = None                                # matches the PyTorch module
    return gate, importance, top_k_indices


def init_weights(key, out_dim):
    """Deterministic synthetic weights for the FullyFusedMLP (no biases,
    matching tcnn FullyFusedMLP semantics)."""
    ks = jax.random.split(key, 5)
    w0 = jax.random.normal(ks[0], (IN_DIM, HIDDEN), jnp.float32) * 0.2
    w1 = jax.random.normal(ks[1], (HIDDEN, HIDDEN), jnp.float32) * 0.1
    w2 = jax.random.normal(ks[2], (HIDDEN, HIDDEN), jnp.float32) * 0.1
    w3 = jax.random.normal(ks[3], (HIDDEN, HIDDEN), jnp.float32) * 0.1
    wo = jax.random.normal(ks[4], (HIDDEN, out_dim), jnp.float32) * 0.1
    return (w0, w1, w2, w3, wo)


def reference_forward(x, weights):
    w0, w1, w2, w3, wo = weights
    h = jnp.maximum(x @ w0, 0.0)
    h = jnp.maximum(h @ w1, 0.0)
    h = jnp.maximum(h @ w2, 0.0)
    h = jnp.maximum(h @ w3, 0.0)
    logits = h @ wo
    gate = jax.nn.softmax(logits, axis=1)
    return gate, gate.sum(0)


if __name__ == "__main__":
    key = jax.random.PRNGKey(0)
    k_x, k_w = jax.random.split(key)

    out_dim = 16
    N = 1000  # deliberately not a tile multiple: exercises the masked last tile

    x = jax.random.normal(k_x, (N, IN_DIM), jnp.float32)
    weights = init_weights(k_w, out_dim)

    # Small tile for the demo so the grid has several steps; production default
    # (tile_n=2048) is used when called without the override.
    gate, importance, top_k = ray_gate_forward(x, weights, tile_n=256)
    jax.block_until_ready((gate, importance))

    # sanity check vs. pure-JAX reference
    gate_ref, imp_ref = reference_forward(x, weights)
    assert gate.shape == (N, out_dim)
    assert importance.shape == (out_dim,)
    assert top_k is None
    assert jnp.allclose(gate, gate_ref, atol=1e-5, rtol=1e-5)
    assert jnp.allclose(importance, imp_ref, atol=1e-3, rtol=1e-5)

    print("KERNEL_OK")
</pallas_src>

<mosaic_0001>
module attributes {stable_mosaic.version = 11 : i64} {
  func.func @ray_gate_kernel(%arg0: i32, %arg1: memref<256x6xf32, #tpu.memory_space<vmem>>, %arg2: memref<6x64xf32, #tpu.memory_space<vmem>>, %arg3: memref<64x64xf32, #tpu.memory_space<vmem>>, %arg4: memref<64x64xf32, #tpu.memory_space<vmem>>, %arg5: memref<64x64xf32, #tpu.memory_space<vmem>>, %arg6: memref<64x16xf32, #tpu.memory_space<vmem>>, %arg7: memref<256x16xf32, #tpu.memory_space<vmem>>, %arg8: memref<1x1x16xf32, #tpu.memory_space<vmem>>) attributes {dimension_semantics = [#tpu.dimension_semantics<parallel>], iteration_bounds = array<i64: 4>, scalar_prefetch = 0 : i64, scratch_operands = 0 : i64, tpu.core_type = #tpu.core_type<tc>, window_params = [{transform_indices = @transform_0, window_bounds = array<i64: 256, 6>}, {pipeline_mode = #tpu.pipeline_mode<synchronous>, transform_indices = @transform_1, window_bounds = array<i64: 6, 64>}, {pipeline_mode = #tpu.pipeline_mode<synchronous>, transform_indices = @transform_2, window_bounds = array<i64: 64, 64>}, {pipeline_mode = #tpu.pipeline_mode<synchronous>, transform_indices = @transform_3, window_bounds = array<i64: 64, 64>}, {pipeline_mode = #tpu.pipeline_mode<synchronous>, transform_indices = @transform_4, window_bounds = array<i64: 64, 64>}, {pipeline_mode = #tpu.pipeline_mode<synchronous>, transform_indices = @transform_5, window_bounds = array<i64: 64, 16>}, {transform_indices = @transform_6, window_bounds = array<i64: 256, 16>}, {transform_indices = @transform_7, window_bounds = array<i64: 1, 1, 16>}]} {
    %c0 = arith.constant 0 : index
    %c0_0 = arith.constant 0 : index
    %0 = vector.load %arg1[%c0, %c0_0] : memref<256x6xf32, #tpu.memory_space<vmem>>, vector<256x6xf32>
    %c0_1 = arith.constant 0 : index
    %c0_2 = arith.constant 0 : index
    %1 = vector.load %arg2[%c0_1, %c0_2] : memref<6x64xf32, #tpu.memory_space<vmem>>, vector<6x64xf32>
    %cst = arith.constant dense<0.000000e+00> : vector<256x64xf32>
    %2 = tpu.matmul %0, %1, %cst {dimension_numbers = #tpu.dot_dimension_numbers<[1], [0], [0], [1], [0, 0, 1, 1], [], []>} : vector<256x6xf32>, vector<6x64xf32>, vector<256x64xf32> -> vector<256x64xf32>
    %cst_3 = arith.constant 0.000000e+00 : f32
    %3 = vector.broadcast %cst_3 : f32 to vector<256x64xf32>
    %4 = arith.maximumf %2, %3 : vector<256x64xf32>
    %c0_4 = arith.constant 0 : index
    %c0_5 = arith.constant 0 : index
    %5 = vector.load %arg3[%c0_4, %c0_5] : memref<64x64xf32, #tpu.memory_space<vmem>>, vector<64x64xf32>
    %cst_6 = arith.constant dense<0.000000e+00> : vector<256x64xf32>
    %6 = tpu.matmul %4, %5, %cst_6 {dimension_numbers = #tpu.dot_dimension_numbers<[1], [0], [0], [1], [0, 0, 1, 1], [], []>} : vector<256x64xf32>, vector<64x64xf32>, vector<256x64xf32> -> vector<256x64xf32>
    %cst_7 = arith.constant 0.000000e+00 : f32
    %7 = vector.broadcast %cst_7 : f32 to vector<256x64xf32>
    %8 = arith.maximumf %6, %7 : vector<256x64xf32>
    %c0_8 = arith.constant 0 : index
    %c0_9 = arith.constant 0 : index
    %9 = vector.load %arg4[%c0_8, %c0_9] : memref<64x64xf32, #tpu.memory_space<vmem>>, vector<64x64xf32>
    %cst_10 = arith.constant dense<0.000000e+00> : vector<256x64xf32>
    %10 = tpu.matmul %8, %9, %cst_10 {dimension_numbers = #tpu.dot_dimension_numbers<[1], [0], [0], [1], [0, 0, 1, 1], [], []>} : vector<256x64xf32>, vector<64x64xf32>, vector<256x64xf32> -> vector<256x64xf32>
    %cst_11 = arith.constant 0.000000e+00 : f32
    %11 = vector.broadcast %cst_11 : f32 to vector<256x64xf32>
    %12 = arith.maximumf %10, %11 : vector<256x64xf32>
    %c0_12 = arith.constant 0 : index
    %c0_13 = arith.constant 0 : index
    %13 = vector.load %arg5[%c0_12, %c0_13] : memref<64x64xf32, #tpu.memory_space<vmem>>, vector<64x64xf32>
    %cst_14 = arith.constant dense<0.000000e+00> : vector<256x64xf32>
    %14 = tpu.matmul %12, %13, %cst_14 {dimension_numbers = #tpu.dot_dimension_numbers<[1], [0], [0], [1], [0, 0, 1, 1], [], []>} : vector<256x64xf32>, vector<64x64xf32>, vector<256x64xf32> -> vector<256x64xf32>
    %cst_15 = arith.constant 0.000000e+00 : f32
    %15 = vector.broadcast %cst_15 : f32 to vector<256x64xf32>
    %16 = arith.maximumf %14, %15 : vector<256x64xf32>
    %c0_16 = arith.constant 0 : index
    %c0_17 = arith.constant 0 : index
    %17 = vector.load %arg6[%c0_16, %c0_17] : memref<64x16xf32, #tpu.memory_space<vmem>>, vector<64x16xf32>
    %cst_18 = arith.constant dense<0.000000e+00> : vector<256x16xf32>
    %18 = tpu.matmul %16, %17, %cst_18 {dimension_numbers = #tpu.dot_dimension_numbers<[1], [0], [0], [1], [0, 0, 1, 1], [], []>} : vector<256x64xf32>, vector<64x16xf32>, vector<256x16xf32> -> vector<256x16xf32>
    %cst_19 = arith.constant dense<0xFF800000> : vector<256xf32>
    %19 = vector.multi_reduction <maximumf>, %18, %cst_19 [1] : vector<256x16xf32> to vector<256xf32>
    %20 = vector.shape_cast %19 : vector<256xf32> to vector<256x1xf32>
    %21 = vector.broadcast %20 : vector<256x1xf32> to vector<256x16xf32>
    %22 = arith.subf %18, %21 : vector<256x16xf32>
    %23 = math.exp %22 : vector<256x16xf32>
    %cst_20 = arith.constant dense<0.000000e+00> : vector<256xf32>
    %24 = vector.multi_reduction <add>, %23, %cst_20 [1] : vector<256x16xf32> to vector<256xf32>
    %25 = vector.shape_cast %24 : vector<256xf32> to vector<256x1xf32>
    %26 = tpu.reciprocal %25 : vector<256x1xf32> -> vector<256x1xf32>
    %27 = vector.broadcast %26 : vector<256x1xf32> to vector<256x16xf32>
    %28 = arith.mulf %23, %27 : vector<256x16xf32>
    %c0_21 = arith.constant 0 : index
    %c0_22 = arith.constant 0 : index
    %29 = vector.load %arg7[%c0_21, %c0_22] : memref<256x16xf32, #tpu.memory_space<vmem>>, vector<256x16xf32>
    tpu.vector_store %arg7[%c0_21, %c0_22], %28 {strides = array<i32>} : memref<256x16xf32, #tpu.memory_space<vmem>>, vector<256x16xf32>,
    %c256_i32 = arith.constant 256 : i32
    %30 = arith.muli %arg0, %c256_i32 : i32
    %31 = tpu.iota {dimensions = array<i32: 0>} : vector<256x1xi32>
    %32 = vector.broadcast %30 : i32 to vector<256x1xi32>
    %33 = arith.addi %31, %32 : vector<256x1xi32>
    %c1000_i32 = arith.constant 1000 : i32
    %34 = vector.broadcast %c1000_i32 : i32 to vector<256x1xi32>
    %35 = arith.cmpi slt, %33, %34 : vector<256x1xi32>
    %cst_23 = arith.constant 0.000000e+00 : f32
    %36 = vector.shape_cast %35 : vector<256x1xi1> to vector<256x1xi1>
    %37 = vector.broadcast %36 : vector<256x1xi1> to vector<256x16xi1>
    %38 = vector.broadcast %cst_23 : f32 to vector<256x16xf32>
    %39 = arith.select %37, %28, %38 : vector<256x16xi1>, vector<256x16xf32>
    %cst_24 = arith.constant dense<0.000000e+00> : vector<16xf32>
    %40 = vector.multi_reduction <add>, %39, %cst_24 [0] : vector<256x16xf32> to vector<16xf32>
    %41 = vector.shape_cast %40 : vector<16xf32> to vector<1x16xf32>
    %42 = vector.shape_cast %41 : vector<1x16xf32> to vector<1x1x16xf32>
    %c0_25 = arith.constant 0 : index
    %c0_26 = arith.constant 0 : index
    %c0_27 = arith.constant 0 : index
    %43 = vector.load %arg8[%c0_25, %c0_26, %c0_27] : memref<1x1x16xf32, #tpu.memory_space<vmem>>, vector<1x1x16xf32>
    tpu.vector_store %arg8[%c0_25, %c0_26, %c0_27], %42 {strides = array<i32>} : memref<1x1x16xf32, #tpu.memory_space<vmem>>, vector<1x1x16xf32>,
    return
  }
  func.func @transform_0(%arg0: i32) -> (i32, i32) {
    %c0_i32 = arith.constant 0 : i32
    %c0_i32_0 = arith.constant 0 : i32
    return %arg0, %c0_i32 : i32, i32
  }
  func.func @transform_1(%arg0: i32) -> (i32, i32) {
    %c0_i32 = arith.constant 0 : i32
    %c0_i32_0 = arith.constant 0 : i32
    %c0_i32_1 = arith.constant 0 : i32
    return %c0_i32, %c0_i32_0 : i32, i32
  }
  func.func @transform_2(%arg0: i32) -> (i32, i32) {
    %c0_i32 = arith.constant 0 : i32
    %c0_i32_0 = arith.constant 0 : i32
    %c0_i32_1 = arith.constant 0 : i32
    return %c0_i32, %c0_i32_0 : i32, i32
  }
  func.func @transform_3(%arg0: i32) -> (i32, i32) {
    %c0_i32 = arith.constant 0 : i32
    %c0_i32_0 = arith.constant 0 : i32
    %c0_i32_1 = arith.constant 0 : i32
    return %c0_i32, %c0_i32_0 : i32, i32
  }
  func.func @transform_4(%arg0: i32) -> (i32, i32) {
    %c0_i32 = arith.constant 0 : i32
    %c0_i32_0 = arith.constant 0 : i32
    %c0_i32_1 = arith.constant 0 : i32
    return %c0_i32, %c0_i32_0 : i32, i32
  }
  func.func @transform_5(%arg0: i32) -> (i32, i32) {
    %c0_i32 = arith.constant 0 : i32
    %c0_i32_0 = arith.constant 0 : i32
    %c0_i32_1 = arith.constant 0 : i32
    return %c0_i32, %c0_i32_0 : i32, i32
  }
  func.func @transform_6(%arg0: i32) -> (i32, i32) {
    %c0_i32 = arith.constant 0 : i32
    %c0_i32_0 = arith.constant 0 : i32
    return %arg0, %c0_i32 : i32, i32
  }
  func.func @transform_7(%arg0: i32) -> (i32, i32, i32) {
    %c0_i32 = arith.constant 0 : i32
    %c0_i32_0 = arith.constant 0 : i32
    %c0_i32_1 = arith.constant 0 : i32
    return %arg0, %c0_i32, %c0_i32_0 : i32, i32, i32
  }
}

</mosaic_0001>

<bundles_post_ra>
// kernel: tpu_custom_call.1
= control target key start
LH: loop header
LB: loop body
LE: loop exit
PB: predicated region body
PF: predicated region fallthrough
CT: control target
= control target key end

     0   :  { %13 = vsyncpa [#allocation3], 0  ;;  %s4223_s0 = inlined_call_operand.vmem [shape: f32[1024,6], index: 0, kind: input, shape index: {}]   ;;  %s4224_s1 = inlined_call_operand.vmem [shape: f32[6,64], index: 1, kind: input, shape index: {}]   ;;  %s4225_s2 = inlined_call_operand.vmem [shape: f32[64,64], index: 2, kind: input, shape index: {}]   ;;  %s4226_s3 = inlined_call_operand.vmem [shape: f32[64,64], index: 3, kind: input, shape index: {}]   ;;  %s4227_s4 = inlined_call_operand.vmem [shape: f32[64,64], index: 4, kind: input, shape index: {}]   ;;  %s4228_s5 = inlined_call_operand.vmem [shape: f32[64,16], index: 5, kind: input, shape index: {}]   ;;  %s4229_s6 = inlined_call_operand.vmem [shape: f32[1024,16], index: 6, kind: output, shape index: {0}]   ;;  %s4230_s7 = inlined_call_operand.hbm [shape: f32[4,1,16], index: 7, kind: output, shape index: {1}]  }
   0x1   :  { %15 = vsyncpa [#allocation3 + $0x1], 0  ;;  %s3159_s24 = smov 0   ;;  %s3161_s25 = smov 0  }
   0x2   :  { %s3163_s26 = smov 0   ;;  %s3165_s27 = smov 0  }
   0x3 LB: > { %s3180_s28 = sadd.s32 4294967295, %s3117_s27   ;;  %s2705_s29 = sadd.s32 4294967294, %s3117_s27   ;;  %s3117_s27 = sphi %s3165_s27, %s4240_s27   ;;  %s3113_s26 = sphi %s3163_s26, %s4239_s26   ;;  %s3109_s25 = sphi %s3161_s25, %s4238_s25   ;;  %s3105_s24 = sphi %s3159_s24, %s4237_s24  }
   0x4   : > { %s3184_s30 = sadd.s32 1, %s3117_s27   ;;  %s185_s8 = sadd.s32 1, %s3113_s26 }
   0x5   : > { %s182_s9 = ssub.s32 %s3117_s27, %s3184_s30  ;;  %p195_p0 = scmp.ne.s32.totalorder %s3113_s26, %s3109_s25 }
   0x6   : > { %p183_p1 = scmp.eq.s32.totalorder %s182_s9, 0  ;;  %p196_p2 = scmp.eq.s32.totalorder %s3180_s28, 3 }
   0x7   : > { %p201_p3 = scmp.ne.s32.totalorder %s3109_s25, %s3105_s24  ;;  %p202_p4 = scmp.eq.s32.totalorder %s2705_s29, 3 }
   0x8   : > { %s3195_s10 = scalar_select %p183_p1, %s3113_s26, %s185_s8  }
   0x9   : > { %p3197_p5 = por %p196_p2, %p195_p0  ;;  %p3201_p6 = por %p202_p4, %p201_p3 }
   0xa   : > { %p2708_p7 = scmp.ge.s32.totalorder %s3117_s27, 1  ;;  %p244_p8 = scmp.lt.s32.totalorder %s3117_s27, 5 }
   0xc   : > { %p245_p9 = pnand %p2708_p7, %p244_p8 }
   0xd   : > { %s2709_s15 = sshll.u32 (!%p245_p9), %s3180_s28, 5  ;;  %s2874_s9 = sshll.u32 (!%p245_p9), %s3180_s28, 8 }
   0xe   : > { %248 = sbr.rel (%p245_p9) target bundleno = 1211 (0x4bb), region = 44  ;;  %p281_p10 = scmp.lt.s32.totalorder (!%p245_p9), %s2709_s15, 127 }
   0xf   : > { %s2621_s18 = scalar_lea.hbm (!%p245_p9), %s4230_s7, %s3180_s28  ;;  %s3075_s13 = scalar_lea.hbm (!%p245_p9), %s4230_s7, 4 }
  0x10   : > { %s2625_s22 = sshll.u32 (!%p245_p9), %s2621_s18, 4  ;;  %s2626_s22 = int_to_ptr.hbm [resolvable:$true] %s2625_s22 }
  0x11   : > { %s3069_s29 = sshra.s32 (!%p245_p9), %s2626_s22, 4  ;;  %s3070_s29 = int_to_ptr.hbm [resolvable:$true] %s3069_s29 }
  0x12   : > { %s3071_s8 = scalar_lea.hbm (!%p245_p9), %s3070_s29, 1  ;;  %p3076_p0 = scmp.lt.s32.totalorder (!%p245_p9), %s3070_s29, %s4230_s7 }
  0x13   : > { %v324_v0 = vld [vmem:[%s4224_s1] sm:$0x3f]  ;;  %vm422_vm0 = vcmask 1045504   ;;  %s4242_s15 = smov (!%p281_p10, %s2709_s15), 127  ;;  %vm325_vm1 = vcmask 48128   ;;  %v578_v6 = vld [vmem:[%s4225_s2 + $0x38] sm:$0xff]  ;;  %p3072_p11 = scmp.ne.s32.totalorder %s3070_s29, %s3071_s8 }
  0x14   : > { %2713 = vmatpush.msk.msra.mxu0 %vm422_vm0, %v324_v0  ;;  %2877 = vmatpush.msk.msra.mxu1 %vm422_vm0, %v324_v0  ;;  %s2710_s16 = sshll.u32 %s4242_s15, 3  ;;  %v577_v9 = vld [vmem:[%s4225_s2 + $0x30] sm:$0xff]  ;;  %v576_v10 = vld [vmem:[%s4225_s2 + $0x28] sm:$0xff]  ;;  %v575_v11 = vld [vmem:[%s4225_s2 + $0x20] sm:$0xff]  ;;  %vm579_vm2 = vcmask 523264   ;;  %vm1536_vm3 = vcmask 130048   ;;  %p3077_p1 = scmp.lt.s32.totalorder %s3075_s13, %s3071_s8 }
  0x15   : > { %2878 = vmatpush.msk.msra.mxu2 %vm422_vm0, %v324_v0  ;;  %2879 = vmatpush.msk.msra.mxu3 %vm422_vm0, %v324_v0  ;;  %s3219_s19 = scalar_lea.vmem %s4223_s0, %s2710_s16  ;;  %v574_v12 = vld [vmem:[%s4225_s2 + $0x18] sm:$0xff]  ;;  %v573_v15 = vld [vmem:[%s4225_s2 + $0x10] sm:$0xff]  ;;  %v572_v16 = vld [vmem:[%s4225_s2 + $0x8] sm:$0xff]  ;;  %s3747_s17 = scalar_lea.vmem %s4229_s6, %s2710_s16 }
  0x16   : > { %v292_v1 = vld [vmem:[%s3219_s19] sm:$0xff]  ;;  %v293_v2 = vld [vmem:[%s3219_s19 + $0x8] sm:$0xff]  ;;  %v294_v3 = vld [vmem:[%s3219_s19 + $0x10] sm:$0xff]  ;;  %684 = vmatpush.msrb.mxu1 %v578_v6  ;;  %s278_s15 = sand.u32 1, %s3109_s25   ;;  %p3073_p12 = pnand %p3072_p11, %p3197_p5 }
  0x17   : > { %2714 = vmatmul.msk.f32.vlgmr.msra.gmra.mxu0 %vm325_vm1, %v292_v1  ;;  %v295_v4 = vld [vmem:[%s3219_s19 + $0x18] sm:$0xff]  ;;  %v301_v5 = vld [vmem:[%s3219_s19 + $0x48] sm:$0xff]  ;;  %v296_v7 = vld [vmem:[%s3219_s19 + $0x20] sm:$0xff]  ;;  %s279_s20 = scalar_lea.vmem [#allocation2], %s278_s15  ;;  %s2609_s23 = scalar_lea.sflag [#allocation3], %s278_s15 }
  0x18   : > { %2723 = vmatmul.msk.f32.vlgmr.msra.gmra.mxu1 %vm325_vm1, %v301_v5  ;;  %v302_v8 = vld [vmem:[%s3219_s19 + $0x50] sm:$0xff]  ;;  %v297_v13 = vld [vmem:[%s3219_s19 + $0x28] sm:$0xff]  ;;  %v303_v14 = vld [vmem:[%s3219_s19 + $0x58] sm:$0xff]  ;;  %s2623_s21 = sshll.u32 %s279_s20, 4  ;;  %p3074_p13 = pneg %p3073_p12  ;;  %s2624_s21 = int_to_ptr.vmem [resolvable:$true] %s2623_s21 }
  0x19   : > { %685 = vmatpush.msrb.mxu1 %v577_v9  ;;  %v298_v17 = vld [vmem:[%s3219_s19 + $0x30] sm:$0xff]  ;;  %v304_v18 = vld [vmem:[%s3219_s19 + $0x60] sm:$0xff]  ;;  %v299_v20 = vld [vmem:[%s3219_s19 + $0x38] sm:$0xff]  ;;  %p3078_p2 = por %p3077_p1, %p3076_p0 }
  0x1a   : > { %v571_v19 = vld [vmem:[%s4225_s2] sm:$0xff]  ;;  %v305_v21 = vld [vmem:[%s3219_s19 + $0x68] sm:$0xff]  ;;  %v306_v23 = vld [vmem:[%s3219_s19 + $0x70] sm:$0xff] }
  0x1b   : > { %686 = vmatpush.msrb.mxu1 %v576_v10  ;;  %v300_v22 = vld [vmem:[%s3219_s19 + $0x40] sm:$0xff]  ;;  %v307_v24 = vld [vmem:[%s3219_s19 + $0x78] sm:$0xff]  ;;  %v309_v26 = vld [vmem:[%s3219_s19 + $0x88] sm:$0xff]  ;;  %p3079_p3 = pnand %p3078_p2, %p3074_p13 }
  0x1c   : > { %v308_v25 = vld [vmem:[%s3219_s19 + $0x80] sm:$0xff]  ;;  %v310_v27 = vld [vmem:[%s3219_s19 + $0x90] sm:$0xff]  ;;  %v311_v28 = vld [vmem:[%s3219_s19 + $0x98] sm:$0xff] }
  0x1d   : > { %687 = vmatpush.msrb.mxu1 %v575_v11  ;;  %2732 = vmatmul.msk.f32.vlgmr.msra.gmra.mxu2 %vm325_vm1, %v310_v27  ;;  %v312_v29 = vld [vmem:[%s3219_s19 + $0xa0] sm:$0xff]  ;;  %v313_v32 = vld [vmem:[%s3219_s19 + $0xa8] sm:$0xff]  ;;  %v314_v35 = vld [vmem:[%s3219_s19 + $0xb0] sm:$0xff] }
  0x1e   : > { %v315_v38 = vld [vmem:[%s3219_s19 + $0xb8] sm:$0xff]  ;;  %v316_v41 = vld [vmem:[%s3219_s19 + $0xc0] sm:$0xff]  ;;  %v317_v45 = vld [vmem:[%s3219_s19 + $0xc8] sm:$0xff] }
  0x1f   : > { %2715 = vmatmul.msk.f32.gmra.mxu0 %vm325_vm1, %v293_v2  ;;  %688 = vmatpush.msrb.mxu1 %v574_v12  ;;  %v828_v44 = vld [vmem:[%s4226_s3 + $0x38] sm:$0xff]  ;;  %v827_v49 = vld [vmem:[%s4226_s3 + $0x30] sm:$0xff]  ;;  %v826_v54 = vld [vmem:[%s4226_s3 + $0x28] sm:$0xff] }
  0x20   : > { %2724 = vmatmul.msk.f32.gmra.mxu1 %vm325_vm1, %v302_v8  ;;  %933 = vmatpush.msrb.mxu2 %v828_v44  ;;  %v318_v50 = vld [vmem:[%s3219_s19 + $0xd0] sm:$0xff]  ;;  %v319_v55 = vld [vmem:[%s3219_s19 + $0xd8] sm:$0xff]  ;;  %v825_v59 = vld [vmem:[%s4226_s3 + $0x20] sm:$0xff] }
  0x21   : > { %689 = vmatpush.msrb.mxu1 %v573_v15  ;;  %2740 = vmatmul.msk.f32.vlgmr.msra.gmra.mxu3 %vm325_vm1, %v318_v50  ;;  %v320_v60 = vld [vmem:[%s3219_s19 + $0xe0] sm:$0xff]  ;;  %v824_v63 = vld [vmem:[%s4226_s3 + $0x18] sm:$0xff]  ;;  %v321_v0 = vld [vmem:[%s3219_s19 + $0xe8] sm:$0xff] }
  0x22   : > { %934 = vmatpush.msrb.mxu2 %v827_v49  ;;  %v323_v8 = vld [vmem:[%s3219_s19 + $0xf8] sm:$0xff]  ;;  %v821_v11 = vld [vmem:[%s4226_s3] sm:$0xff] }
  0x23   : > { %690 = vmatpush.msrb.mxu1 %v572_v16  ;;  %v1077_v49 = vld [vmem:[%s4227_s4 + $0x38] sm:$0xff] }
  0x24   : > { %935 = vmatpush.msrb.mxu2 %v826_v54  ;;  %1182 = vmatpush.msrb.mxu3 %v1077_v49 }
  0x25   : > { %691 = vmatpush.msrb.mxu1 %v571_v19  ;;  %2733 = vmatmul.msk.f32.gmra.mxu2 %vm325_vm1, %v311_v28 }
  0x26   : > { %936 = vmatpush.msrb.mxu2 %v825_v59 }
  0x27   : > { %2716 = vmatmul.msk.f32.gmra.mxu0 %vm325_vm1, %v294_v3  ;;  %v823_v3 = vld [vmem:[%s4226_s3 + $0x10] sm:$0xff] }
  0x28   : > { %2725 = vmatmul.msk.f32.gmra.mxu1 %vm325_vm1, %v303_v14  ;;  %937 = vmatpush.msrb.mxu2 %v824_v63 }
  0x29   : > { %2741 = vmatmul.msk.f32.gmra.mxu3 %vm325_vm1, %v319_v55 }
  0x2a   : > { %938 = vmatpush.msrb.mxu2 %v823_v3  ;;  %v1072_v3 = vld [vmem:[%s4227_s4 + $0x10] sm:$0xff] }
  0x2d   : > { %2734 = vmatmul.msk.f32.gmra.mxu2 %vm325_vm1, %v312_v29 }
  0x2f   : > { %2717 = vmatmul.msk.f32.gmra.mxu0 %vm325_vm1, %v295_v4  ;;  %v322_v4 = vld [vmem:[%s3219_s19 + $0xf0] sm:$0xff] }
  0x30   : > { %2726 = vmatmul.msk.f32.gmra.mxu1 %vm325_vm1, %v304_v18 }
  0x31   : > { %2742 = vmatmul.msk.f32.gmra.mxu3 %vm325_vm1, %v320_v60 }
  0x35   : > { %2735 = vmatmul.msk.f32.gmra.mxu2 %vm325_vm1, %v313_v32 }
  0x37   : > { %2718 = vmatmul.msk.f32.gmra.mxu0 %vm325_vm1, %v296_v7  ;;  %v822_v7 = vld [vmem:[%s4226_s3 + $0x8] sm:$0xff] }
  0x38   : > { %2727 = vmatmul.msk.f32.gmra.mxu1 %vm325_vm1, %v305_v21  ;;  %939 = vmatpush.msrb.mxu2 %v822_v7 }
  0x39   : > { %2743 = vmatmul.msk.f32.gmra.mxu3 %vm325_vm1, %v321_v0 }
  0x3a   : > { %940 = vmatpush.msrb.mxu2 %v821_v11 }
  0x3d   : > { %2736 = vmatmul.msk.f32.gmra.mxu2 %vm325_vm1, %v314_v35 }
  0x3f   : > { %2719 = vmatmul.msk.f32.gmra.mxu0 %vm325_vm1, %v297_v13 }
  0x40   : > { %2728 = vmatmul.msk.f32.gmra.mxu1 %vm325_vm1, %v306_v23 }
  0x41   : > { %2744 = vmatmul.msk.f32.gmra.mxu3 %vm325_vm1, %v322_v4 }
  0x45   : > { %2737 = vmatmul.msk.f32.gmra.mxu2 %vm325_vm1, %v315_v38 }
  0x47   : > { %2720 = vmatmul.msk.f32.gmra.mxu0 %vm325_vm1, %v298_v17 }
  0x48   : > { %2729 = vmatmul.msk.f32.gmra.mxu1 %vm325_vm1, %v307_v24 }
  0x49   : > { %2745 = vmatmul.msk.f32.gmra.mxu3 %vm325_vm1, %v323_v8  ;;  %v1071_v8 = vld [vmem:[%s4227_s4 + $0x8] sm:$0xff] }
  0x4d   : > { %2738 = vmatmul.msk.f32.gmra.mxu2 %vm325_vm1, %v316_v41 }
  0x4f   : > { %2721 = vmatmul.msk.f32.gmra.mxu0 %vm325_vm1, %v299_v20 }
  0x50   : > { %2730 = vmatmul.msk.f32.gmra.mxu1 %vm325_vm1, %v308_v25 }
  0x55   : > { %2739 = vmatmul.msk.f32.gmra.mxu2 %vm325_vm1, %v317_v45 }
  0x57   : > { %2722 = vmatmul.msk.f32.gmra.mxu0 %vm325_vm1, %v300_v22 }
  0x58   : > { %2731 = vmatmul.msk.f32.gmra.mxu1 %vm325_vm1, %v309_v26 }
  0x94   : > { %v443_v30 = vpop.f32.mrf.mxu0 }
  0x95   : > { %v539_v31 = vmax.f32 %v443_v30, 0.0  ;;  %v470_v46 = vpop.f32.mrf.mxu1 }
  0x96   : > { %v548_v2 = vmax.f32 %v470_v46, 0.0 }
  0x97   : > { %2746 = vmatmul.msk.f32.vlgmr.msrb.gmra.mxu1 %vm579_vm2, %v539_v31 }
  0x9c   : > { %v446_v33 = vpop.f32.mrf.mxu0 }
  0x9d   : > { %v540_v34 = vmax.f32 %v446_v33, 0.0  ;;  %v473_v52 = vpop.f32.mrf.mxu1 }
  0x9e   : > { %v549_v6 = vmax.f32 %v473_v52, 0.0 }
  0x9f   : > { %2747 = vmatmul.msk.f32.gmra.mxu1 %vm579_vm2, %v540_v34 }
  0xa0   : > { %v497_v19 = vpop.f32.mrf.mxu2 }
  0xa1   : > { %v557_v27 = vmax.f32 %v497_v19, 0.0 }
  0xa4   : > { %v449_v36 = vpop.f32.mrf.mxu0  ;;  %v521_v55 = vpop.f32.mrf.mxu3 }
  0xa5   : > { %v541_v37 = vmax.f32 %v449_v36, 0.0  ;;  %v476_v58 = vpop.f32.mrf.mxu1  ;;  %v565_v63 = vmax.f32 %v521_v55, 0.0 }
  0xa6   : > { %v550_v10 = vmax.f32 %v476_v58, 0.0 }
  0xa7   : > { %2748 = vmatmul.msk.f32.gmra.mxu1 %vm579_vm2, %v541_v37 }
  0xa8   : > { %v500_v24 = vpop.f32.mrf.mxu2 }
  0xa9   : > { %v558_v31 = vmax.f32 %v500_v24, 0.0 }
  0xac   : > { %v452_v39 = vpop.f32.mrf.mxu0 }
  0xad   : > { %v542_v40 = vmax.f32 %v452_v39, 0.0  ;;  %v479_v1 = vpop.f32.mrf.mxu1 }
  0xae   : > { %v551_v12 = vmax.f32 %v479_v1, 0.0 }
  0xaf   : > { %2749 = vmatmul.msk.f32.gmra.mxu1 %vm579_vm2, %v542_v40 }
  0xb0   : > { %v503_v30 = vpop.f32.mrf.mxu2 }
  0xb1   : > { %v559_v35 = vmax.f32 %v503_v30, 0.0 }
  0xb4   : > { %v455_v42 = vpop.f32.mrf.mxu0 }
  0xb5   : > { %v543_v43 = vmax.f32 %v455_v42, 0.0  ;;  %v482_v5 = vpop.f32.mrf.mxu1 }
  0xb6   : > { %v552_v14 = vmax.f32 %v482_v5, 0.0 }
  0xb7   : > { %2750 = vmatmul.msk.f32.gmra.mxu1 %vm579_vm2, %v543_v43 }
  0xb8   : > { %v506_v34 = vpop.f32.mrf.mxu2 }
  0xb9   : > { %v560_v39 = vmax.f32 %v506_v34, 0.0 }
  0xbc   : > { %v458_v47 = vpop.f32.mrf.mxu0 }
  0xbd   : > { %v544_v48 = vmax.f32 %v458_v47, 0.0  ;;  %v485_v9 = vpop.f32.mrf.mxu1 }
  0xbe   : > { %v553_v16 = vmax.f32 %v485_v9, 0.0 }
  0xbf   : > { %2751 = vmatmul.msk.f32.gmra.mxu1 %vm579_vm2, %v544_v48 }
  0xc0   : > { %v509_v38 = vpop.f32.mrf.mxu2 }
  0xc1   : > { %v561_v42 = vmax.f32 %v509_v38, 0.0 }
  0xc4   : > { %v461_v51 = vpop.f32.mrf.mxu0 }
  0xc5   : > { %v545_v53 = vmax.f32 %v461_v51, 0.0  ;;  %v488_v13 = vpop.f32.mrf.mxu1  ;;  %v1076_v51 = vld [vmem:[%s4227_s4 + $0x30] sm:$0xff] }
  0xc6   : > { %v554_v18 = vmax.f32 %v488_v13, 0.0  ;;  %1183 = vmatpush.msrb.mxu3 %v1076_v51  ;;  %v1070_v13 = vld [vmem:[%s4227_s4] sm:$0xff]  ;;  %v1326_v51 = vld [vmem:[%s4228_s5 + $0x38] sm:$0xff] }
  0xc7   : > { %2752 = vmatmul.msk.f32.gmra.mxu1 %vm579_vm2, %v545_v53  ;;  %1431 = vmatpush.msrb.mxu0 %v1326_v51 }
  0xc8   : > { %v512_v44 = vpop.f32.mrf.mxu2 }
  0xc9   : > { %v562_v46 = vmax.f32 %v512_v44, 0.0 }
  0xcc   : > { %v464_v56 = vpop.f32.mrf.mxu0 }
  0xcd   : > { %v546_v57 = vmax.f32 %v464_v56, 0.0  ;;  %v491_v15 = vpop.f32.mrf.mxu1  ;;  %v1075_v56 = vld [vmem:[%s4227_s4 + $0x28] sm:$0xff] }
  0xce   : > { %v555_v21 = vmax.f32 %v491_v15, 0.0  ;;  %1184 = vmatpush.msrb.mxu3 %v1075_v56  ;;  %v1325_v56 = vld [vmem:[%s4228_s5 + $0x30] sm:$0xff] }
  0xcf   : > { %2753 = vmatmul.msk.f32.gmra.mxu1 %vm579_vm2, %v546_v57  ;;  %1432 = vmatpush.msrb.mxu0 %v1325_v56 }
  0xd0   : > { %v515_v50 = vpop.f32.mrf.mxu2 }
  0xd1   : > { %v563_v52 = vmax.f32 %v515_v50, 0.0 }
  0xd4   : > { %v467_v61 = vpop.f32.mrf.mxu0 }
  0xd5   : > { %v547_v62 = vmax.f32 %v467_v61, 0.0  ;;  %v494_v17 = vpop.f32.mrf.mxu1  ;;  %v1074_v61 = vld [vmem:[%s4227_s4 + $0x20] sm:$0xff] }
  0xd6   : > { %v556_v25 = vmax.f32 %v494_v17, 0.0  ;;  %1185 = vmatpush.msrb.mxu3 %v1074_v61  ;;  %v1324_v61 = vld [vmem:[%s4228_s5 + $0x28] sm:$0xff] }
  0xd7   : > { %2754 = vmatmul.msk.f32.gmra.mxu1 %vm579_vm2, %v547_v62  ;;  %v524_v62 = vpop.f32.mrf.mxu3  ;;  %1433 = vmatpush.msrb.mxu0 %v1324_v61 }
  0xd8   : > { %v518_v57 = vpop.f32.mrf.mxu2  ;;  %v566_v5 = vmax.f32 %v524_v62, 0.0 }
  0xd9   : > { %v564_v58 = vmax.f32 %v518_v57, 0.0 }
  0xdf   : > { %2755 = vmatmul.msk.f32.gmra.mxu1 %vm579_vm2, %v548_v2  ;;  %v1073_v2 = vld [vmem:[%s4227_s4 + $0x18] sm:$0xff]  ;;  %v527_v4 = vpop.f32.mrf.mxu3 }
  0xe0   : > { %1186 = vmatpush.msrb.mxu3 %v1073_v2  ;;  %v567_v9 = vmax.f32 %v527_v4, 0.0  ;;  %v1323_v4 = vld [vmem:[%s4228_s5 + $0x20] sm:$0xff] }
  0xe1   : > { %1434 = vmatpush.msrb.mxu0 %v1323_v4 }
  0xe2   : > { %1187 = vmatpush.msrb.mxu3 %v1072_v3 }
  0xe4   : > { %1188 = vmatpush.msrb.mxu3 %v1071_v8 }
  0xe6   : > { %1189 = vmatpush.msrb.mxu3 %v1070_v13 }
  0xe7   : > { %2756 = vmatmul.msk.f32.gmra.mxu1 %vm579_vm2, %v549_v6  ;;  %v530_v11 = vpop.f32.mrf.mxu3 }
  0xe8   : > { %2880 = vmatpush.msra.mxu3 %v1326_v51 }
  0xea   : > { %2881 = vmatpush.msra.mxu3 %v1325_v56 }
  0xec   : > { %2882 = vmatpush.msra.mxu3 %v1324_v61 }
  0xee   : > { %2883 = vmatpush.msra.mxu3 %v1323_v4 }
  0xef   : > { %2757 = vmatmul.msk.f32.gmra.mxu1 %vm579_vm2, %v550_v10  ;;  %v533_v17 = vpop.f32.mrf.mxu3 }
  0xf7   : > { %2758 = vmatmul.msk.f32.gmra.mxu1 %vm579_vm2, %v551_v12 }
  0xff   : > { %2759 = vmatmul.msk.f32.gmra.mxu1 %vm579_vm2, %v552_v14  ;;  %v568_v14 = vmax.f32 %v530_v11, 0.0 }
 0x107   : > { %2760 = vmatmul.msk.f32.gmra.mxu1 %vm579_vm2, %v553_v16 }
 0x10f   : > { %2761 = vmatmul.msk.f32.gmra.mxu1 %vm579_vm2, %v554_v18  ;;  %v569_v18 = vmax.f32 %v533_v17, 0.0 }
 0x114   : > { %v693_v20 = vpop.f32.mrf.mxu1 }
 0x115   : > { %v789_v22 = vmax.f32 %v693_v20, 0.0 }
 0x117   : > { %2762 = vmatmul.msk.f32.gmra.mxu1 %vm579_vm2, %v555_v21  ;;  %2778 = vmatmul.msk.f32.vlgmr.msrb.gmra.mxu2 %vm579_vm2, %v789_v22  ;;  %v536_v21 = vpop.f32.mrf.mxu3 }
 0x118   : > { %v570_v22 = vmax.f32 %v536_v21, 0.0  ;;  %v1320_v21 = vld [vmem:[%s4228_s5 + $0x8] sm:$0xff] }
 0x11c   : > { %v696_v23 = vpop.f32.mrf.mxu1 }
 0x11d   : > { %v790_v26 = vmax.f32 %v696_v23, 0.0 }
 0x11f   : > { %2763 = vmatmul.msk.f32.gmra.mxu1 %vm579_vm2, %v556_v25  ;;  %2779 = vmatmul.msk.f32.gmra.mxu2 %vm579_vm2, %v790_v26 }
 0x124   : > { %v699_v28 = vpop.f32.mrf.mxu1 }
 0x125   : > { %v791_v29 = vmax.f32 %v699_v28, 0.0 }
 0x127   : > { %2764 = vmatmul.msk.f32.gmra.mxu1 %vm579_vm2, %v557_v27  ;;  %2780 = vmatmul.msk.f32.gmra.mxu2 %vm579_vm2, %v791_v29 }
 0x12c   : > { %v702_v32 = vpop.f32.mrf.mxu1 }
 0x12d   : > { %v792_v33 = vmax.f32 %v702_v32, 0.0 }
 0x12f   : > { %2765 = vmatmul.msk.f32.gmra.mxu1 %vm579_vm2, %v558_v31  ;;  %2781 = vmatmul.msk.f32.gmra.mxu2 %vm579_vm2, %v792_v33 }
 0x134   : > { %v705_v36 = vpop.f32.mrf.mxu1 }
 0x135   : > { %v793_v37 = vmax.f32 %v705_v36, 0.0 }
 0x137   : > { %2766 = vmatmul.msk.f32.gmra.mxu1 %vm579_vm2, %v559_v35  ;;  %2782 = vmatmul.msk.f32.gmra.mxu2 %vm579_vm2, %v793_v37 }
 0x13c   : > { %v708_v40 = vpop.f32.mrf.mxu1 }
 0x13d   : > { %v794_v41 = vmax.f32 %v708_v40, 0.0 }
 0x13f   : > { %2767 = vmatmul.msk.f32.gmra.mxu1 %vm579_vm2, %v560_v39  ;;  %2783 = vmatmul.msk.f32.gmra.mxu2 %vm579_vm2, %v794_v41 }
 0x144   : > { %v711_v43 = vpop.f32.mrf.mxu1 }
 0x145   : > { %v795_v45 = vmax.f32 %v711_v43, 0.0 }
 0x147   : > { %2768 = vmatmul.msk.f32.gmra.mxu1 %vm579_vm2, %v561_v42  ;;  %2784 = vmatmul.msk.f32.gmra.mxu2 %vm579_vm2, %v795_v45 }
 0x14c   : > { %v714_v47 = vpop.f32.mrf.mxu1 }
 0x14d   : > { %v796_v48 = vmax.f32 %v714_v47, 0.0 }
 0x14f   : > { %2769 = vmatmul.msk.f32.gmra.mxu1 %vm579_vm2, %v562_v46  ;;  %2785 = vmatmul.msk.f32.gmra.mxu2 %vm579_vm2, %v796_v48 }
 0x154   : > { %v717_v53 = vpop.f32.mrf.mxu1 }
 0x155   : > { %v797_v54 = vmax.f32 %v717_v53, 0.0 }
 0x157   : > { %2770 = vmatmul.msk.f32.gmra.mxu1 %vm579_vm2, %v563_v52  ;;  %2786 = vmatmul.msk.f32.gmra.mxu2 %vm579_vm2, %v797_v54 }
 0x15c   : > { %v720_v59 = vpop.f32.mrf.mxu1 }
 0x15d   : > { %v798_v60 = vmax.f32 %v720_v59, 0.0 }
 0x15f   : > { %2771 = vmatmul.msk.f32.gmra.mxu1 %vm579_vm2, %v564_v58  ;;  %2787 = vmatmul.msk.f32.gmra.mxu2 %vm579_vm2, %v798_v60 }
 0x164   : > { %v723_v0 = vpop.f32.mrf.mxu1 }
 0x165   : > { %v799_v1 = vmax.f32 %v723_v0, 0.0 }
 0x167   : > { %2772 = vmatmul.msk.f32.gmra.mxu1 %vm579_vm2, %v565_v63  ;;  %2788 = vmatmul.msk.f32.gmra.mxu2 %vm579_vm2, %v799_v1 }
 0x16c   : > { %v726_v6 = vpop.f32.mrf.mxu1 }
 0x16d   : > { %v800_v7 = vmax.f32 %v726_v6, 0.0 }
 0x16f   : > { %2773 = vmatmul.msk.f32.gmra.mxu1 %vm579_vm2, %v566_v5  ;;  %2789 = vmatmul.msk.f32.gmra.mxu2 %vm579_vm2, %v800_v7 }
 0x174   : > { %v729_v10 = vpop.f32.mrf.mxu1 }
 0x175   : > { %v801_v12 = vmax.f32 %v729_v10, 0.0 }
 0x177   : > { %2774 = vmatmul.msk.f32.gmra.mxu1 %vm579_vm2, %v567_v9  ;;  %2790 = vmatmul.msk.f32.gmra.mxu2 %vm579_vm2, %v801_v12  ;;  %v1322_v9 = vld [vmem:[%s4228_s5 + $0x18] sm:$0xff] }
 0x178   : > { %1435 = vmatpush.msrb.mxu0 %v1322_v9  ;;  %2884 = vmatpush.msra.mxu3 %v1322_v9 }
 0x17c   : > { %v732_v15 = vpop.f32.mrf.mxu1 }
 0x17d   : > { %v802_v16 = vmax.f32 %v732_v15, 0.0 }
 0x17f   : > { %2775 = vmatmul.msk.f32.gmra.mxu1 %vm579_vm2, %v568_v14  ;;  %2791 = vmatmul.msk.f32.gmra.mxu2 %vm579_vm2, %v802_v16  ;;  %v1321_v14 = vld [vmem:[%s4228_s5 + $0x10] sm:$0xff] }
 0x180   : > { %1436 = vmatpush.msrb.mxu0 %v1321_v14  ;;  %2885 = vmatpush.msra.mxu3 %v1321_v14 }
 0x182   : > { %1437 = vmatpush.msrb.mxu0 %v1320_v21  ;;  %2886 = vmatpush.msra.mxu3 %v1320_v21 }
 0x184   : > { %v735_v19 = vpop.f32.mrf.mxu1 }
 0x185   : > { %v803_v20 = vmax.f32 %v735_v19, 0.0 }
 0x187   : > { %2776 = vmatmul.msk.f32.gmra.mxu1 %vm579_vm2, %v569_v18  ;;  %2792 = vmatmul.msk.f32.gmra.mxu2 %vm579_vm2, %v803_v20 }
 0x18c   : > { %v738_v23 = vpop.f32.mrf.mxu1 }
 0x18d   : > { %v804_v24 = vmax.f32 %v738_v23, 0.0 }
 0x18f   : > { %2777 = vmatmul.msk.f32.gmra.mxu1 %vm579_vm2, %v570_v22  ;;  %2793 = vmatmul.msk.f32.gmra.mxu2 %vm579_vm2, %v804_v24  ;;  %v1319_v22 = vld [vmem:[%s4228_s5] sm:$0xff] }
 0x190   : > { %1438 = vmatpush.msrb.mxu0 %v1319_v22  ;;  %2887 = vmatpush.msra.mxu3 %v1319_v22 }
 0x194   : > { %v741_v25 = vpop.f32.mrf.mxu1 }
 0x195   : > { %v805_v26 = vmax.f32 %v741_v25, 0.0 }
 0x197   : > { %2794 = vmatmul.msk.f32.gmra.mxu2 %vm579_vm2, %v805_v26 }
 0x19a   : > { %v942_v27 = vpop.f32.mrf.mxu2 }
 0x19b   : > { %v1038_v28 = vmax.f32 %v942_v27, 0.0 }
 0x19c   : > { %v744_v29 = vpop.f32.mrf.mxu1 }
 0x19d   : > { %v806_v30 = vmax.f32 %v744_v29, 0.0  ;;  %2810 = vmatmul.msk.f32.vlgmr.msrb.gmra.mxu3 %vm579_vm2, %v1038_v28 }
 0x19f   : > { %2795 = vmatmul.msk.f32.gmra.mxu2 %vm579_vm2, %v806_v30 }
 0x1a2   : > { %v945_v31 = vpop.f32.mrf.mxu2 }
 0x1a3   : > { %v1039_v32 = vmax.f32 %v945_v31, 0.0 }
 0x1a4   : > { %v747_v33 = vpop.f32.mrf.mxu1 }
 0x1a5   : > { %v807_v34 = vmax.f32 %v747_v33, 0.0  ;;  %2811 = vmatmul.msk.f32.gmra.mxu3 %vm579_vm2, %v1039_v32 }
 0x1a7   : > { %2796 = vmatmul.msk.f32.gmra.mxu2 %vm579_vm2, %v807_v34 }
 0x1aa   : > { %v948_v35 = vpop.f32.mrf.mxu2 }
 0x1ab   : > { %v1040_v36 = vmax.f32 %v948_v35, 0.0 }
 0x1ac   : > { %v750_v37 = vpop.f32.mrf.mxu1 }
 0x1ad   : > { %v808_v38 = vmax.f32 %v750_v37, 0.0  ;;  %2812 = vmatmul.msk.f32.gmra.mxu3 %vm579_vm2, %v1040_v36 }
 0x1af   : > { %2797 = vmatmul.msk.f32.gmra.mxu2 %vm579_vm2, %v808_v38 }
 0x1b2   : > { %v951_v39 = vpop.f32.mrf.mxu2 }
 0x1b3   : > { %v1041_v40 = vmax.f32 %v951_v39, 0.0 }
 0x1b4   : > { %v753_v41 = vpop.f32.mrf.mxu1 }
 0x1b5   : > { %v809_v42 = vmax.f32 %v753_v41, 0.0  ;;  %2813 = vmatmul.msk.f32.gmra.mxu3 %vm579_vm2, %v1041_v40 }
 0x1b7   : > { %2798 = vmatmul.msk.f32.gmra.mxu2 %vm579_vm2, %v809_v42 }
 0x1ba   : > { %v954_v43 = vpop.f32.mrf.mxu2 }
 0x1bb   : > { %v1042_v44 = vmax.f32 %v954_v43, 0.0 }
 0x1bc   : > { %v756_v45 = vpop.f32.mrf.mxu1 }
 0x1bd   : > { %v810_v46 = vmax.f32 %v756_v45, 0.0  ;;  %2814 = vmatmul.msk.f32.gmra.mxu3 %vm579_vm2, %v1042_v44 }
 0x1bf   : > { %2799 = vmatmul.msk.f32.gmra.mxu2 %vm579_vm2, %v810_v46 }
 0x1c2   : > { %v957_v47 = vpop.f32.mrf.mxu2 }
 0x1c3   : > { %v1043_v48 = vmax.f32 %v957_v47, 0.0 }
 0x1c4   : > { %v759_v49 = vpop.f32.mrf.mxu1 }
 0x1c5   : > { %v811_v50 = vmax.f32 %v759_v49, 0.0  ;;  %2815 = vmatmul.msk.f32.gmra.mxu3 %vm579_vm2, %v1043_v48 }
 0x1c7   : > { %2800 = vmatmul.msk.f32.gmra.mxu2 %vm579_vm2, %v811_v50 }
 0x1ca   : > { %v960_v52 = vpop.f32.mrf.mxu2 }
 0x1cb   : > { %v1044_v53 = vmax.f32 %v960_v52, 0.0 }
 0x1cc   : > { %v762_v54 = vpop.f32.mrf.mxu1 }
 0x1cd   : > { %v812_v55 = vmax.f32 %v762_v54, 0.0  ;;  %2816 = vmatmul.msk.f32.gmra.mxu3 %vm579_vm2, %v1044_v53 }
 0x1cf   : > { %2801 = vmatmul.msk.f32.gmra.mxu2 %vm579_vm2, %v812_v55 }
 0x1d2   : > { %v963_v57 = vpop.f32.mrf.mxu2 }
 0x1d3   : > { %v1045_v58 = vmax.f32 %v963_v57, 0.0 }
 0x1d4   : > { %v765_v59 = vpop.f32.mrf.mxu1 }
 0x1d5   : > { %v813_v60 = vmax.f32 %v765_v59, 0.0  ;;  %2817 = vmatmul.msk.f32.gmra.mxu3 %vm579_vm2, %v1045_v58 }
 0x1d7   : > { %2802 = vmatmul.msk.f32.gmra.mxu2 %vm579_vm2, %v813_v60 }
 0x1da   : > { %v966_v62 = vpop.f32.mrf.mxu2 }
 0x1db   : > { %v1046_v63 = vmax.f32 %v966_v62, 0.0 }
 0x1dc   : > { %v768_v0 = vpop.f32.mrf.mxu1 }
 0x1dd   : > { %v814_v1 = vmax.f32 %v768_v0, 0.0  ;;  %2818 = vmatmul.msk.f32.gmra.mxu3 %vm579_vm2, %v1046_v63 }
 0x1df   : > { %2803 = vmatmul.msk.f32.gmra.mxu2 %vm579_vm2, %v814_v1 }
 0x1e2   : > { %v969_v2 = vpop.f32.mrf.mxu2 }
 0x1e3   : > { %v1047_v3 = vmax.f32 %v969_v2, 0.0 }
 0x1e4   : > { %v771_v5 = vpop.f32.mrf.mxu1 }
 0x1e5   : > { %v815_v6 = vmax.f32 %v771_v5, 0.0  ;;  %2819 = vmatmul.msk.f32.gmra.mxu3 %vm579_vm2, %v1047_v3 }
 0x1e7   : > { %2804 = vmatmul.msk.f32.gmra.mxu2 %vm579_vm2, %v815_v6 }
 0x1ea   : > { %v972_v7 = vpop.f32.mrf.mxu2 }
 0x1eb   : > { %v1048_v8 = vmax.f32 %v972_v7, 0.0 }
 0x1ec   : > { %v774_v10 = vpop.f32.mrf.mxu1 }
 0x1ed   : > { %v816_v11 = vmax.f32 %v774_v10, 0.0  ;;  %2820 = vmatmul.msk.f32.gmra.mxu3 %vm579_vm2, %v1048_v8 }
 0x1ef   : > { %2805 = vmatmul.msk.f32.gmra.mxu2 %vm579_vm2, %v816_v11 }
 0x1f2   : > { %v975_v12 = vpop.f32.mrf.mxu2 }
 0x1f3   : > { %v1049_v13 = vmax.f32 %v975_v12, 0.0 }
 0x1f4   : > { %v777_v15 = vpop.f32.mrf.mxu1 }
 0x1f5   : > { %v817_v16 = vmax.f32 %v777_v15, 0.0  ;;  %2821 = vmatmul.msk.f32.gmra.mxu3 %vm579_vm2, %v1049_v13 }
 0x1f7   : > { %2806 = vmatmul.msk.f32.gmra.mxu2 %vm579_vm2, %v817_v16 }
 0x1fa   : > { %v978_v17 = vpop.f32.mrf.mxu2 }
 0x1fb   : > { %v1050_v18 = vmax.f32 %v978_v17, 0.0 }
 0x1fc   : > { %v780_v19 = vpop.f32.mrf.mxu1 }
 0x1fd   : > { %v818_v20 = vmax.f32 %v780_v19, 0.0  ;;  %2822 = vmatmul.msk.f32.gmra.mxu3 %vm579_vm2, %v1050_v18 }
 0x1ff   : > { %2807 = vmatmul.msk.f32.gmra.mxu2 %vm579_vm2, %v818_v20 }
 0x202   : > { %v981_v23 = vpop.f32.mrf.mxu2 }
 0x203   : > { %v1051_v24 = vmax.f32 %v981_v23, 0.0 }
 0x204   : > { %v783_v25 = vpop.f32.mrf.mxu1 }
 0x205   : > { %v819_v26 = vmax.f32 %v783_v25, 0.0  ;;  %2823 = vmatmul.msk.f32.gmra.mxu3 %vm579_vm2, %v1051_v24 }
 0x207   : > { %2808 = vmatmul.msk.f32.gmra.mxu2 %vm579_vm2, %v819_v26 }
 0x20a   : > { %v984_v27 = vpop.f32.mrf.mxu2 }
 0x20b   : > { %v1052_v28 = vmax.f32 %v984_v27, 0.0 }
 0x20c   : > { %v786_v29 = vpop.f32.mrf.mxu1 }
 0x20d   : > { %v820_v30 = vmax.f32 %v786_v29, 0.0  ;;  %2824 = vmatmul.msk.f32.gmra.mxu3 %vm579_vm2, %v1052_v28 }
 0x20f   : > { %2809 = vmatmul.msk.f32.gmra.mxu2 %vm579_vm2, %v820_v30 }
 0x212   : > { %v987_v31 = vpop.f32.mrf.mxu2 }
 0x213   : > { %v1053_v32 = vmax.f32 %v987_v31, 0.0 }
 0x215   : > { %2825 = vmatmul.msk.f32.gmra.mxu3 %vm579_vm2, %v1053_v32 }
 0x21a   : > { %v990_v33 = vpop.f32.mrf.mxu2 }
 0x21b   : > { %v1054_v34 = vmax.f32 %v990_v33, 0.0 }
 0x21d   : > { %2826 = vmatmul.msk.f32.gmra.mxu3 %vm579_vm2, %v1054_v34 }
 0x220   : > { %v1191_v35 = vpop.f32.mrf.mxu3 }
 0x221   : > { %v1287_v36 = vmax.f32 %v1191_v35, 0.0 }
 0x222   : > { %v993_v37 = vpop.f32.mrf.mxu2 }
 0x223   : > { %v1055_v38 = vmax.f32 %v993_v37, 0.0  ;;  %2842 = vmatmul.msk.f32.vlgmr.msrb.gmra.mxu0 %vm579_vm2, %v1287_v36 }
 0x225   : > { %2827 = vmatmul.msk.f32.gmra.mxu3 %vm579_vm2, %v1055_v38 }
 0x228   : > { %v1194_v39 = vpop.f32.mrf.mxu3 }
 0x229   : > { %v1288_v40 = vmax.f32 %v1194_v39, 0.0 }
 0x22a   : > { %v996_v41 = vpop.f32.mrf.mxu2 }
 0x22b   : > { %v1056_v42 = vmax.f32 %v996_v41, 0.0  ;;  %2843 = vmatmul.msk.f32.gmra.mxu0 %vm579_vm2, %v1288_v40 }
 0x22d   : > { %2828 = vmatmul.msk.f32.gmra.mxu3 %vm579_vm2, %v1056_v42 }
 0x230   : > { %v1197_v43 = vpop.f32.mrf.mxu3 }
 0x231   : > { %v1289_v44 = vmax.f32 %v1197_v43, 0.0 }
 0x232   : > { %v999_v45 = vpop.f32.mrf.mxu2 }
 0x233   : > { %v1057_v46 = vmax.f32 %v999_v45, 0.0  ;;  %2844 = vmatmul.msk.f32.gmra.mxu0 %vm579_vm2, %v1289_v44 }
 0x235   : > { %2829 = vmatmul.msk.f32.gmra.mxu3 %vm579_vm2, %v1057_v46 }
 0x238   : > { %v1200_v47 = vpop.f32.mrf.mxu3 }
 0x239   : > { %v1290_v48 = vmax.f32 %v1200_v47, 0.0 }
 0x23a   : > { %v1002_v49 = vpop.f32.mrf.mxu2 }
 0x23b   : > { %v1058_v50 = vmax.f32 %v1002_v49, 0.0  ;;  %2845 = vmatmul.msk.f32.gmra.mxu0 %vm579_vm2, %v1290_v48 }
 0x23d   : > { %2830 = vmatmul.msk.f32.gmra.mxu3 %vm579_vm2, %v1058_v50 }
 0x240   : > { %v1203_v51 = vpop.f32.mrf.mxu3 }
 0x241   : > { %v1291_v52 = vmax.f32 %v1203_v51, 0.0 }
 0x242   : > { %v1005_v53 = vpop.f32.mrf.mxu2 }
 0x243   : > { %v1059_v54 = vmax.f32 %v1005_v53, 0.0  ;;  %2846 = vmatmul.msk.f32.gmra.mxu0 %vm579_vm2, %v1291_v52 }
 0x245   : > { %2831 = vmatmul.msk.f32.gmra.mxu3 %vm579_vm2, %v1059_v54 }
 0x248   : > { %v1206_v55 = vpop.f32.mrf.mxu3 }
 0x249   : > { %v1292_v56 = vmax.f32 %v1206_v55, 0.0 }
 0x24a   : > { %v1008_v57 = vpop.f32.mrf.mxu2 }
 0x24b   : > { %v1060_v58 = vmax.f32 %v1008_v57, 0.0  ;;  %2847 = vmatmul.msk.f32.gmra.mxu0 %vm579_vm2, %v1292_v56 }
 0x24d   : > { %2832 = vmatmul.msk.f32.gmra.mxu3 %vm579_vm2, %v1060_v58 }
 0x250   : > { %v1209_v59 = vpop.f32.mrf.mxu3 }
 0x251   : > { %v1293_v60 = vmax.f32 %v1209_v59, 0.0 }
 0x252   : > { %v1011_v61 = vpop.f32.mrf.mxu2 }
 0x253   : > { %v1061_v62 = vmax.f32 %v1011_v61, 0.0  ;;  %2848 = vmatmul.msk.f32.gmra.mxu0 %vm579_vm2, %v1293_v60 }
 0x255   : > { %2833 = vmatmul.msk.f32.gmra.mxu3 %vm579_vm2, %v1061_v62 }
 0x258   : > { %v1212_v63 = vpop.f32.mrf.mxu3 }
 0x259   : > { %v1294_v0 = vmax.f32 %v1212_v63, 0.0 }
 0x25a   : > { %v1014_v1 = vpop.f32.mrf.mxu2 }
 0x25b   : > { %v1062_v2 = vmax.f32 %v1014_v1, 0.0  ;;  %2849 = vmatmul.msk.f32.gmra.mxu0 %vm579_vm2, %v1294_v0 }
 0x25d   : > { %2834 = vmatmul.msk.f32.gmra.mxu3 %vm579_vm2, %v1062_v2 }
 0x260   : > { %v1215_v3 = vpop.f32.mrf.mxu3 }
 0x261   : > { %v1295_v4 = vmax.f32 %v1215_v3, 0.0 }
 0x262   : > { %v1017_v5 = vpop.f32.mrf.mxu2 }
 0x263   : > { %v1063_v6 = vmax.f32 %v1017_v5, 0.0  ;;  %2850 = vmatmul.msk.f32.gmra.mxu0 %vm579_vm2, %v1295_v4 }
 0x265   : > { %2835 = vmatmul.msk.f32.gmra.mxu3 %vm579_vm2, %v1063_v6 }
 0x268   : > { %v1218_v7 = vpop.f32.mrf.mxu3 }
 0x269   : > { %v1296_v8 = vmax.f32 %v1218_v7, 0.0 }
 0x26a   : > { %v1020_v9 = vpop.f32.mrf.mxu2 }
 0x26b   : > { %v1064_v10 = vmax.f32 %v1020_v9, 0.0  ;;  %2851 = vmatmul.msk.f32.gmra.mxu0 %vm579_vm2, %v1296_v8 }
 0x26d   : > { %2836 = vmatmul.msk.f32.gmra.mxu3 %vm579_vm2, %v1064_v10 }
 0x270   : > { %v1221_v11 = vpop.f32.mrf.mxu3 }
 0x271   : > { %v1297_v12 = vmax.f32 %v1221_v11, 0.0 }
 0x272   : > { %v1023_v13 = vpop.f32.mrf.mxu2 }
 0x273   : > { %v1065_v14 = vmax.f32 %v1023_v13, 0.0  ;;  %2852 = vmatmul.msk.f32.gmra.mxu0 %vm579_vm2, %v1297_v12 }
 0x275   : > { %2837 = vmatmul.msk.f32.gmra.mxu3 %vm579_vm2, %v1065_v14 }
 0x278   : > { %v1224_v15 = vpop.f32.mrf.mxu3 }
 0x279   : > { %v1298_v16 = vmax.f32 %v1224_v15, 0.0 }
 0x27a   : > { %v1026_v17 = vpop.f32.mrf.mxu2 }
 0x27b   : > { %v1066_v18 = vmax.f32 %v1026_v17, 0.0  ;;  %2853 = vmatmul.msk.f32.gmra.mxu0 %vm579_vm2, %v1298_v16 }
 0x27d   : > { %2838 = vmatmul.msk.f32.gmra.mxu3 %vm579_vm2, %v1066_v18 }
 0x280   : > { %v1227_v19 = vpop.f32.mrf.mxu3 }
 0x281   : > { %v1299_v20 = vmax.f32 %v1227_v19, 0.0 }
 0x282   : > { %v1029_v21 = vpop.f32.mrf.mxu2 }
 0x283   : > { %v1067_v22 = vmax.f32 %v1029_v21, 0.0  ;;  %2854 = vmatmul.msk.f32.gmra.mxu0 %vm579_vm2, %v1299_v20 }
 0x285   : > { %2839 = vmatmul.msk.f32.gmra.mxu3 %vm579_vm2, %v1067_v22 }
 0x288   : > { %v1230_v23 = vpop.f32.mrf.mxu3 }
 0x289   : > { %v1300_v24 = vmax.f32 %v1230_v23, 0.0 }
 0x28a   : > { %v1032_v25 = vpop.f32.mrf.mxu2 }
 0x28b   : > { %v1068_v26 = vmax.f32 %v1032_v25, 0.0  ;;  %2855 = vmatmul.msk.f32.gmra.mxu0 %vm579_vm2, %v1300_v24 }
 0x28d   : > { %2840 = vmatmul.msk.f32.gmra.mxu3 %vm579_vm2, %v1068_v26 }
 0x290   : > { %v1233_v27 = vpop.f32.mrf.mxu3 }
 0x291   : > { %v1301_v28 = vmax.f32 %v1233_v27, 0.0 }
 0x292   : > { %v1035_v29 = vpop.f32.mrf.mxu2 }
 0x293   : > { %v1069_v30 = vmax.f32 %v1035_v29, 0.0  ;;  %2856 = vmatmul.msk.f32.gmra.mxu0 %vm579_vm2, %v1301_v28 }
 0x295   : > { %2841 = vmatmul.msk.f32.gmra.mxu3 %vm579_vm2, %v1069_v30 }
 0x298   : > { %v1236_v31 = vpop.f32.mrf.mxu3 }
 0x299   : > { %v1302_v32 = vmax.f32 %v1236_v31, 0.0 }
 0x29b   : > { %2857 = vmatmul.msk.f32.gmra.mxu0 %vm579_vm2, %v1302_v32 }
 0x2a0   : > { %v1239_v33 = vpop.f32.mrf.mxu3  ;;  %v3493_v34 = vpop.f32.mrf.mxu0 }
 0x2a1   : > { %v1303_v35 = vmax.f32 %v1239_v33, 0.0  ;;  %v1537_v36 = vsel %vm1536_vm3, %v3493_v34, -inf }
 0x2a2   : > { %1538 = vmax.xlane.f32.xlu0 %v1537_v36 }
 0x2a3   : > { %2858 = vmatmul.msk.f32.gmra.mxu0 %vm579_vm2, %v1303_v35 }
 0x2a8   : > { %v1242_v37 = vpop.f32.mrf.mxu3  ;;  %v3498_v38 = vpop.f32.mrf.mxu0 }
 0x2a9   : > { %v1304_v39 = vmax.f32 %v1242_v37, 0.0  ;;  %v1540_v40 = vsel %vm1536_vm3, %v3498_v38, -inf }
 0x2aa   : > { %1541 = vmax.xlane.f32.xlu0 %v1540_v40 }
 0x2ab   : > { %2859 = vmatmul.msk.f32.gmra.mxu0 %vm579_vm2, %v1304_v39 }
 0x2b0   : > { %v1245_v41 = vpop.f32.mrf.mxu3  ;;  %v3503_v42 = vpop.f32.mrf.mxu0 }
 0x2b1   : > { %v1305_v43 = vmax.f32 %v1245_v41, 0.0  ;;  %v1543_v44 = vsel %vm1536_vm3, %v3503_v42, -inf }
 0x2b2   : > { %1544 = vmax.xlane.f32.xlu1 %v1543_v44 }
 0x2b3   : > { %2860 = vmatmul.msk.f32.gmra.mxu0 %vm579_vm2, %v1305_v43 }
 0x2b8   : > { %v1248_v45 = vpop.f32.mrf.mxu3  ;;  %v3508_v46 = vpop.f32.mrf.mxu0 }
 0x2b9   : > { %v1306_v47 = vmax.f32 %v1248_v45, 0.0  ;;  %v1546_v48 = vsel %vm1536_vm3, %v3508_v46, -inf }
 0x2ba   : > { %1547 = vmax.xlane.f32.xlu1 %v1546_v48 }
 0x2bb   : > { %2861 = vmatmul.msk.f32.gmra.mxu0 %vm579_vm2, %v1306_v47 }
 0x2c0   : > { %v1251_v49 = vpop.f32.mrf.mxu3  ;;  %v3513_v50 = vpop.f32.mrf.mxu0 }
 0x2c1   : > { %v1307_v51 = vmax.f32 %v1251_v49, 0.0  ;;  %v1549_v52 = vsel %vm1536_vm3, %v3513_v50, -inf }
 0x2c2   : > { %1550 = vmax.xlane.f32.xlu2 %v1549_v52 }
 0x2c3   : > { %2862 = vmatmul.msk.f32.gmra.mxu0 %vm579_vm2, %v1307_v51 }
 0x2c8   : > { %v1254_v53 = vpop.f32.mrf.mxu3  ;;  %v3518_v54 = vpop.f32.mrf.mxu0 }
 0x2c9   : > { %v1308_v55 = vmax.f32 %v1254_v53, 0.0  ;;  %v1552_v56 = vsel %vm1536_vm3, %v3518_v54, -inf }
 0x2ca   : > { %1553 = vmax.xlane.f32.xlu2 %v1552_v56 }
 0x2cb   : > { %2863 = vmatmul.msk.f32.gmra.mxu0 %vm579_vm2, %v1308_v55 }
 0x2d0   : > { %v1257_v57 = vpop.f32.mrf.mxu3  ;;  %v3523_v58 = vpop.f32.mrf.mxu0 }
 0x2d1   : > { %v1309_v59 = vmax.f32 %v1257_v57, 0.0  ;;  %v1555_v60 = vsel %vm1536_vm3, %v3523_v58, -inf }
 0x2d2   : > { %1556 = vmax.xlane.f32.xlu0 %v1555_v60 }
 0x2d3   : > { %2864 = vmatmul.msk.f32.gmra.mxu0 %vm579_vm2, %v1309_v59 }
 0x2d8   : > { %v1260_v61 = vpop.f32.mrf.mxu3  ;;  %v3528_v62 = vpop.f32.mrf.mxu0 }
 0x2d9   : > { %v1310_v63 = vmax.f32 %v1260_v61, 0.0  ;;  %v1558_v0 = vsel %vm1536_vm3, %v3528_v62, -inf }
 0x2da   : > { %1559 = vmax.xlane.f32.xlu1 %v1558_v0 }
 0x2db   : > { %2865 = vmatmul.msk.f32.gmra.mxu0 %vm579_vm2, %v1310_v63 }
 0x2e0   : > { %v1263_v1 = vpop.f32.mrf.mxu3  ;;  %v3533_v2 = vpop.f32.mrf.mxu0 }
 0x2e1   : > { %v1311_v3 = vmax.f32 %v1263_v1, 0.0  ;;  %v1561_v4 = vsel %vm1536_vm3, %v3533_v2, -inf }
 0x2e2   : > { %1562 = vmax.xlane.f32.xlu2 %v1561_v4 }
 0x2e3   : > { %2866 = vmatmul.msk.f32.gmra.mxu0 %vm579_vm2, %v1311_v3 }
 0x2e8   : > { %v1266_v5 = vpop.f32.mrf.mxu3  ;;  %v3538_v6 = vpop.f32.mrf.mxu0 }
 0x2e9   : > { %v1312_v7 = vmax.f32 %v1266_v5, 0.0  ;;  %v1564_v8 = vsel %vm1536_vm3, %v3538_v6, -inf }
 0x2ea   : > { %1565 = vmax.xlane.f32.xlu0 %v1564_v8 }
 0x2eb   : > { %2867 = vmatmul.msk.f32.gmra.mxu0 %vm579_vm2, %v1312_v7 }
 0x2f0   : > { %v1269_v9 = vpop.f32.mrf.mxu3  ;;  %v3543_v10 = vpop.f32.mrf.mxu0 }
 0x2f1   : > { %v1313_v11 = vmax.f32 %v1269_v9, 0.0  ;;  %v1567_v12 = vsel %vm1536_vm3, %v3543_v10, -inf }
 0x2f2   : > { %1568 = vmax.xlane.f32.xlu1 %v1567_v12 }
 0x2f3   : > { %2868 = vmatmul.msk.f32.gmra.mxu0 %vm579_vm2, %v1313_v11 }
 0x2f8   : > { %v1272_v13 = vpop.f32.mrf.mxu3  ;;  %v3548_v14 = vpop.f32.mrf.mxu0 }
 0x2f9   : > { %v1314_v15 = vmax.f32 %v1272_v13, 0.0  ;;  %v1570_v16 = vsel %vm1536_vm3, %v3548_v14, -inf }
 0x2fa   : > { %1571 = vmax.xlane.f32.xlu2 %v1570_v16 }
 0x2fb   : > { %2869 = vmatmul.msk.f32.gmra.mxu0 %vm579_vm2, %v1314_v15 }
 0x300   : > { %v1275_v17 = vpop.f32.mrf.mxu3  ;;  %v3553_v18 = vpop.f32.mrf.mxu0 }
 0x301   : > { %v1315_v19 = vmax.f32 %v1275_v17, 0.0  ;;  %v1573_v20 = vsel %vm1536_vm3, %v3553_v18, -inf }
 0x302   : > { %1574 = vmax.xlane.f32.xlu0 %v1573_v20 }
 0x303   : > { %2870 = vmatmul.msk.f32.gmra.mxu0 %vm579_vm2, %v1315_v19 }
 0x308   : > { %v1278_v21 = vpop.f32.mrf.mxu3  ;;  %v3558_v22 = vpop.f32.mrf.mxu0 }
 0x309   : > { %v1316_v23 = vmax.f32 %v1278_v21, 0.0  ;;  %v1576_v24 = vsel %vm1536_vm3, %v3558_v22, -inf }
 0x30a   : > { %1577 = vmax.xlane.f32.xlu1 %v1576_v24 }
 0x30b   : > { %2871 = vmatmul.msk.f32.gmra.mxu0 %vm579_vm2, %v1316_v23 }
 0x310   : > { %v1281_v25 = vpop.f32.mrf.mxu3  ;;  %v3563_v26 = vpop.f32.mrf.mxu0 }
 0x311   : > { %v1317_v27 = vmax.f32 %v1281_v25, 0.0  ;;  %v1579_v28 = vsel %vm1536_vm3, %v3563_v26, -inf }
 0x312   : > { %1580 = vmax.xlane.f32.xlu2 %v1579_v28 }
 0x313   : > { %2872 = vmatmul.msk.f32.gmra.mxu0 %vm579_vm2, %v1317_v27 }
 0x315   : > { %v1539_v29 = vpop.xlane.xlu0 %1538 }
 0x316   : > { %v1633_v30 = vsub.f32 %v3493_v34, %v1539_v29 }
 0x318   : > { %v1284_v31 = vpop.f32.mrf.mxu3  ;;  %v3569_v32 = vpop.f32.mrf.mxu0  ;;  %v1665_v36 = vmul.f32 1.442695, %v1633_v30 }
 0x319   : > { %v1318_v33 = vmax.f32 %v1284_v31, 0.0  ;;  %v1582_v35 = vsel %vm1536_vm3, %v3569_v32, -inf }
 0x31a   : > { %1583 = vmax.xlane.f32.xlu0 %v1582_v35  ;;  %2927 = vpow2.f32 %v1665_v36 }
 0x31b   : > { %2873 = vmatmul.msk.f32.vlgmr.msra.gmra.mxu3 %vm579_vm2, %v1318_v33 }
 0x31d   : > { %v1542_v37 = vpop.xlane.xlu0 %1541 }
 0x31e   : > { %v1634_v39 = vsub.f32 %v3498_v38, %v1542_v37 }
 0x320   : > { %v3575_v40 = vpop.f32.mrf.mxu0  ;;  %v1667_v41 = vmul.f32 1.442695, %v1634_v39  ;;  %v3579_v44 = vpop.eup %2927 }
 0x321   : > { %v1585_v34 = vsel %vm1536_vm3, %v3575_v40, -inf  ;;  %v1729_v49 = vsel %vm1536_vm3, %v3579_v44, 0.0 }
 0x322   : > { %1586 = vmax.xlane.f32.xlu1 %v1585_v34  ;;  %2929 = vpow2.f32 %v1667_v41 }
 0x325   : > { %v1545_v43 = vpop.xlane.xlu1 %1544 }
 0x326   : > { %v1635_v45 = vsub.f32 %v3503_v42, %v1545_v43 }
 0x328   : > { %v1669_v47 = vmul.f32 1.442695, %v1635_v45  ;;  %v3582_v48 = vpop.f32.mrf.mxu0  ;;  %v3588_v52 = vpop.eup %2929 }
 0x329   : > { %v1588_v38 = vsel %vm1536_vm3, %v3582_v48, -inf  ;;  %v1732_v59 = vsel %vm1536_vm3, %v3588_v52, 0.0 }
 0x32a   : > { %2931 = vpow2.f32 %v1669_v47  ;;  %1730 = vadd.xlane.f32.xlu1 %v1729_v49  ;;  %1589 = vmax.xlane.f32.xlu2 %v1588_v38 }
 0x32d   : > { %v1548_v51 = vpop.xlane.xlu1 %1547 }
 0x32e   : > { %v1636_v53 = vsub.f32 %v3508_v46, %v1548_v51 }
 0x330   : > { %v3591_v55 = vpop.eup %2931  ;;  %v1671_v42 = vmul.f32 1.442695, %v1636_v53  ;;  %v3593_v56 = vpop.f32.mrf.mxu0 }
 0x331   : > { %v1735_v57 = vsel %vm1536_vm3, %v3591_v55, 0.0  ;;  %v1591_v60 = vsel %vm1536_vm3, %v3593_v56, -inf }
 0x332   : > { %2933 = vpow2.f32 %v1671_v42  ;;  %1736 = vadd.xlane.f32.xlu1 %v1735_v57  ;;  %1733 = vadd.xlane.f32.xlu2 %v1732_v59 }
 0x333   : > { %1592 = vmax.xlane.f32.xlu0 %v1591_v60 }
 0x335   : > { %v1551_v61 = vpop.xlane.xlu2 %1550 }
 0x336   : > { %v1637_v63 = vsub.f32 %v3513_v50, %v1551_v61 }
 0x338   : > { %v3601_v46 = vpop.eup %2933  ;;  %v3604_v0 = vpop.f32.mrf.mxu0  ;;  %v1673_v4 = vmul.f32 1.442695, %v1637_v63 }
 0x339   : > { %v1738_v1 = vsel %vm1536_vm3, %v3601_v46, 0.0  ;;  %v1594_v3 = vsel %vm1536_vm3, %v3604_v0, -inf }
 0x33a   : > { %1595 = vmax.xlane.f32.xlu1 %v1594_v3  ;;  %2935 = vpow2.f32 %v1673_v4 }
 0x33b   : > { %1739 = vadd.xlane.f32.xlu0 %v1738_v1 }
 0x33d   : > { %v1554_v5 = vpop.xlane.xlu2 %1553 }
 0x33e   : > { %v1638_v7 = vsub.f32 %v3518_v54, %v1554_v5 }
 0x340   : > { %v1675_v8 = vmul.f32 1.442695, %v1638_v7  ;;  %v3611_v9 = vpop.f32.mrf.mxu0  ;;  %v3615_v12 = vpop.eup %2935 }
 0x341   : > { %v1597_v50 = vsel %vm1536_vm3, %v3611_v9, -inf  ;;  %v1741_v19 = vsel %vm1536_vm3, %v3615_v12, 0.0 }
 0x342   : > { %2937 = vpow2.f32 %v1675_v8  ;;  %1598 = vmax.xlane.f32.xlu2 %v1597_v50 }
 0x345   : > { %v1557_v11 = vpop.xlane.xlu0 %1556 }
 0x346   : > { %v1639_v13 = vsub.f32 %v3523_v58, %v1557_v11 }
 0x348   : > { %v3618_v15 = vpop.eup %2937  ;;  %v1677_v16 = vmul.f32 1.442695, %v1639_v13  ;;  %v3620_v17 = vpop.f32.mrf.mxu0 }
 0x349   : > { %v1744_v54 = vsel %vm1536_vm3, %v3618_v15, 0.0  ;;  %v1600_v20 = vsel %vm1536_vm3, %v3620_v17, -inf }
 0x34a   : > { %2939 = vpow2.f32 %v1677_v16  ;;  %1745 = vadd.xlane.f32.xlu1 %v1744_v54  ;;  %1742 = vadd.xlane.f32.xlu2 %v1741_v19 }
 0x34b   : > { %1601 = vmax.xlane.f32.xlu0 %v1600_v20 }
 0x34d   : > { %v1560_v21 = vpop.xlane.xlu1 %1559 }
 0x34e   : > { %v1640_v58 = vsub.f32 %v3528_v62, %v1560_v21 }
 0x350   : > { %v3629_v23 = vpop.eup %2939  ;;  %v1679_v24 = vmul.f32 1.442695, %v1640_v58  ;;  %v3631_v25 = vpop.f32.mrf.mxu0 }
 0x351   : > { %v1747_v27 = vsel %vm1536_vm3, %v3629_v23, 0.0  ;;  %v1603_v28 = vsel %vm1536_vm3, %v3631_v25, -inf }
 0x352   : > { %2941 = vpow2.f32 %v1679_v24  ;;  %1748 = vadd.xlane.f32.xlu2 %v1747_v27  ;;  %1604 = vmax.xlane.f32.xlu1 %v1603_v28 }
 0x355   : > { %v1563_v29 = vpop.xlane.xlu2 %1562 }
 0x356   : > { %v1641_v30 = vsub.f32 %v3533_v2, %v1563_v29 }
 0x358   : > { %v3638_v31 = vpop.eup %2941  ;;  %v1681_v62 = vmul.f32 1.442695, %v1641_v30  ;;  %v3640_v33 = vpop.f32.mrf.mxu0 }
 0x359   : > { %v1750_v35 = vsel %vm1536_vm3, %v3638_v31, 0.0  ;;  %v1606_v36 = vsel %vm1536_vm3, %v3640_v33, -inf }
 0x35a   : > { %2943 = vpow2.f32 %v1681_v62  ;;  %1751 = vadd.xlane.f32.xlu0 %v1750_v35  ;;  %1607 = vmax.xlane.f32.xlu2 %v1606_v36 }
 0x35d   : > { %v1566_v37 = vpop.xlane.xlu0 %1565 }
 0x35e   : > { %v1642_v39 = vsub.f32 %v3538_v6, %v1566_v37 }
 0x360   : > { %v3647_v34 = vpop.eup %2943  ;;  %v1683_v2 = vmul.f32 1.442695, %v1642_v39  ;;  %v3649_v41 = vpop.f32.mrf.mxu0 }
 0x361   : > { %v1753_v43 = vsel %vm1536_vm3, %v3647_v34, 0.0  ;;  %v1609_v45 = vsel %vm1536_vm3, %v3649_v41, -inf }
 0x362   : > { %2945 = vpow2.f32 %v1683_v2  ;;  %1754 = vadd.xlane.f32.xlu1 %v1753_v43  ;;  %1610 = vmax.xlane.f32.xlu0 %v1609_v45 }
 0x365   : > { %v1569_v47 = vpop.xlane.xlu1 %1568 }
 0x366   : > { %v1643_v49 = vsub.f32 %v3543_v10, %v1569_v47 }
 0x368   : > { %v3656_v38 = vpop.eup %2945  ;;  %v1685_v6 = vmul.f32 1.442695, %v1643_v49  ;;  %v3658_v51 = vpop.f32.mrf.mxu0 }
 0x369   : > { %v1756_v53 = vsel %vm1536_vm3, %v3656_v38, 0.0  ;;  %v1612_v42 = vsel %vm1536_vm3, %v3658_v51, -inf }
 0x36a   : > { %2947 = vpow2.f32 %v1685_v6  ;;  %1757 = vadd.xlane.f32.xlu2 %v1756_v53  ;;  %1613 = vmax.xlane.f32.xlu1 %v1612_v42 }
 0x36d   : > { %v1572_v8 = vpop.xlane.xlu2 %1571 }
 0x36e   : > { %v1644_v50 = vsub.f32 %v3548_v14, %v1572_v8 }
 0x370   : > { %v3664_v57 = vpop.eup %2947  ;;  %v3666_v59 = vpop.f32.mrf.mxu0  ;;  %v1687_v16 = vmul.f32 1.442695, %v1644_v50 }
 0x371   : > { %v1759_v10 = vsel %vm1536_vm3, %v3664_v57, 0.0  ;;  %v1615_v60 = vsel %vm1536_vm3, %v3666_v59, -inf }
 0x372   : > { %1760 = vadd.xlane.f32.xlu0 %v1759_v10  ;;  %1616 = vmax.xlane.f32.xlu2 %v1615_v60  ;;  %v2338_v60 = vlaneseq }
 0x374   : > { %v3726_v8 = vshrl.u32 %v2338_v60, 7 }
 0x375   : > { %v1575_v1 = vpop.xlane.xlu0 %1574 }
 0x376   : > { %v1645_v3 = vsub.f32 %v3553_v18, %v1575_v1 }
 0x378   : > { %v3672_v61 = vpop.f32.mrf.mxu0  ;;  %v1689_v7 = vmul.f32 1.442695, %v1645_v3 }
 0x379   : > { %v1618_v63 = vsel %vm1536_vm3, %v3672_v61, -inf }
 0x37a   : > { %1619 = vmax.xlane.f32.xlu0 %v1618_v63  ;;  %2949 = vpow2.f32 %v1689_v7 }
 0x37b   : > { %2951 = vpow2.f32 %v1687_v16 }
 0x37d   : > { %v1578_v54 = vpop.xlane.xlu1 %1577 }
 0x37e   : > { %v1646_v30 = vsub.f32 %v3558_v22, %v1578_v54 }
 0x380   : > { %v3677_v4 = vpop.f32.mrf.mxu0  ;;  %v3686_v20 = vpop.eup %2949 }
 0x381   : > { %v1621_v5 = vsel %vm1536_vm3, %v3677_v4, -inf  ;;  %v1765_v27 = vsel %vm1536_vm3, %v3686_v20, 0.0 }
 0x382   : > { %1622 = vmax.xlane.f32.xlu0 %v1621_v5 }
 0x385   : > { %v1581_v18 = vpop.xlane.xlu2 %1580 }
 0x386   : > { %v1647_v58 = vsub.f32 %v3563_v26, %v1581_v18  ;;  %v1691_v26 = vmul.f32 1.442695, %v1646_v30  ;;  %v2340_v30 = vadd.s32 8, %v3726_v8 }
 0x388   : > { %v3682_v11 = vpop.f32.mrf.mxu0  ;;  %v1693_v29 = vmul.f32 1.442695, %v1647_v58 }
 0x389   : > { %v1624_v13 = vsel %vm1536_vm3, %v3682_v11, -inf }
 0x38a   : > { %1625 = vmax.xlane.f32.xlu2 %v1624_v13 }
 0x38d   : > { %v1584_v19 = vpop.xlane.xlu0 %1583 }
 0x38e   : > { %v1648_v21 = vsub.f32 %v3569_v32, %v1584_v19  ;;  %v3697_v32 = vpop.eup %2951  ;;  %v3731_v19 = vstv %s2874_s9 }
 0x38f   : > { %v1762_v37 = vsel %vm1536_vm3, %v3697_v32, 0.0 }
 0x390   : > { %v1695_v24 = vmul.f32 1.442695, %v1648_v21  ;;  %v3690_v14 = vpop.f32.mrf.mxu0  ;;  %v2341_v21 = vadd.s32 16, %v3726_v8 }
 0x391   : > { %v1627_v28 = vsel %vm1536_vm3, %v3690_v14, -inf }
 0x392   : > { %2953 = vpow2.f32 %v1695_v24  ;;  %1766 = vadd.xlane.f32.xlu2 %v1765_v27  ;;  %1628 = vmax.xlane.f32.xlu1 %v1627_v28 }
 0x393   : > { %2955 = vpow2.f32 %v1693_v29 }
 0x394   : > { %2957 = vpow2.f32 %v1691_v26  ;;  %v2372_v26 = vadd.s32 %v3731_v19, %v3726_v8 }
 0x395   : > { %v1587_v62 = vpop.xlane.xlu1 %1586 }
 0x396   : > { %v1649_v39 = vsub.f32 %v3575_v40, %v1587_v62  ;;  %vm2404_vm9 = vcmp.lt.s32.totalorder %v2372_v26, 1000 }
 0x398   : > { %v3699_v35 = vpop.eup %2953  ;;  %v1697_v6 = vmul.f32 1.442695, %v1649_v39 }
 0x399   : > { %v1774_v36 = vsel %vm1536_vm3, %v3699_v35, 0.0  ;;  %v3706_v43 = vpop.eup %2955 }
 0x39a   : > { %1775 = vadd.xlane.f32.xlu2 %v1774_v36  ;;  %1763 = vadd.xlane.f32.xlu1 %v1762_v37  ;;  %v1771_v42 = vsel %vm1536_vm3, %v3706_v43, 0.0  ;;  %v3715_v40 = vpop.eup %2957 }
 0x39b   : > { %v1768_v7 = vsel %vm1536_vm3, %v3715_v40, 0.0 }
 0x39d   : > { %v1731_v2 = vpop.xlane.xlu1 %1730  ;;  %v1590_v22 = vpop.xlane.xlu2 %1589 }
 0x39e   : > { %2959 = vrcp.f32 %v1731_v2  ;;  %v3708_v45 = vpop.f32.mrf.mxu3  ;;  %v1650_v47 = vsub.f32 %v3582_v48, %v1590_v22  ;;  %v1836_v50 = vand.u32 2147483648, %v1731_v2  ;;  %v1834_v18 = vand.u32 2147483647, %v1731_v2 }
 0x39f   : > { %v1630_v49 = vsel %vm1536_vm3, %v3708_v45, -inf  ;;  %vm1830_vm5 = vweird.f32 %v1731_v2  ;;  %v2374_v22 = vadd.s32 %v3731_v19, %v2341_v21 }
 0x3a0   : > { %1631 = vmax.xlane.f32.xlu0 %v1630_v49  ;;  %v1699_v53 = vmul.f32 1.442695, %v1650_v47  ;;  %v1837_v29 = vor.u32 1.1754944e-38, %v1836_v50  ;;  %vm1835_vm7 = vcmp.eq.f32.partialorder %v1834_v18, 8.507059e+37 }
 0x3a1   : > { %vm2406_vm12 = vcmp.lt.s32.totalorder %v2374_v22, 1000 }
 0x3a2   : > { %1772 = vadd.xlane.f32.xlu1 %v1771_v42  ;;  %2961 = vpow2.f32 %v1699_v53 }
 0x3a3   : > { %2963 = vpow2.f32 %v1697_v6 }
 0x3a4   : > { %v2960_v10 = vpop.eup %2959 }
 0x3a5   : > { %v1826_v63 = vmul.f32 %v2960_v10, %v1731_v2  ;;  %v3717_v1 = vpop.xlane.xlu1 %1736  ;;  %v3719_v48 = vpop.xlane.xlu2 %1733  ;;  %vm1831_vm4 = vweird.f32 %v2960_v10 }
 0x3a6   : > { %2965 = vrcp.f32 %v3717_v1  ;;  %v1593_v3 = vpop.xlane.xlu0 %1592  ;;  %vm1832_vm6 = vmor %vm1830_vm5, %vm1831_vm4  ;;  %v1864_v60 = vand.u32 2147483648, %v3717_v1  ;;  %vm1858_vm11 = vweird.f32 %v3717_v1  ;;  %vm1844_vm14 = vweird.f32 %v3719_v48 }
 0x3a7   : > { %v1827_v5 = vsub.f32 1.0, %v1826_v63  ;;  %2967 = vrcp.f32 %v3719_v48  ;;  %v1651_v13 = vsub.f32 %v3593_v56, %v1593_v3  ;;  %v2373_v63 = vadd.s32 %v3731_v19, %v2340_v30 }
 0x3a8   : > { %1769 = vadd.xlane.f32.xlu0 %v1768_v7  ;;  %v3729_v16 = vpop.eup %2961 }
 0x3a9   : > { %v1828_v54 = vmul.f32 %v2960_v10, %v1827_v5  ;;  %v1701_v58 = vmul.f32 1.442695, %v1651_v13  ;;  %v1780_v24 = vsel %vm1536_vm3, %v3729_v16, 0.0  ;;  %v3736_v27 = vpop.eup %2963  ;;  %vm2405_vm0 = vcmp.lt.s32.totalorder %v2373_v63, 1000 }
 0x3aa   : > { %1781 = vadd.xlane.f32.xlu1 %v1780_v24 }
 0x3ab   : > { %v1829_v28 = vadd.f32 %v2960_v10, %v1828_v54  ;;  %2969 = vpow2.f32 %v1701_v58  ;;  %v1848_v54 = vand.u32 2147483647, %v3719_v48  ;;  %v1865_v58 = vor.u32 1.1754944e-38, %v1864_v60 }
 0x3ac   : > { %v2966_v56 = vpop.eup %2965 }
 0x3ad   : > { %v2968_v62 = vpop.eup %2967  ;;  %v1833_v36 = vsel %vm1832_vm6, %v2960_v10, %v1829_v28  ;;  %v1854_v37 = vmul.f32 %v2966_v56, %v3717_v1  ;;  %v1596_v39 = vpop.xlane.xlu1 %1595  ;;  %v1777_v10 = vsel %vm1536_vm3, %v3736_v27, 0.0  ;;  %vm1859_vm8 = vweird.f32 %v2966_v56 }
 0x3ae   : > { %v1838_v2 = vsel %vm1835_vm7, %v1837_v29, %v1833_v36  ;;  %v1840_v47 = vmul.f32 %v2968_v62, %v3719_v48  ;;  %v3751_v49 = vpop.xlane.xlu0 %1739  ;;  %v1652_v6 = vsub.f32 %v3604_v0, %v1596_v39  ;;  %v1862_v0 = vand.u32 2147483647, %v3717_v1  ;;  %vm1860_vm13 = vmor %vm1858_vm11, %vm1859_vm8 }
 0x3af   : > { %v2273_v53 = vmul.f32 %v3579_v44, %v1838_v2  ;;  %v1855_v42 = vsub.f32 1.0, %v1854_v37  ;;  %2971 = vrcp.f32 %v3751_v49  ;;  %v1850_v44 = vand.u32 2147483648, %v3719_v48 }
 0x3b0   : > { %v1841_v3 = vsub.f32 1.0, %v1840_v47  ;;  %v1703_v5 = vmul.f32 1.442695, %v1652_v6  ;;  %1778 = vadd.xlane.f32.xlu0 %v1777_v10  ;;  %vm1845_vm10 = vweird.f32 %v2968_v62  ;;  %vm1863_vm15 = vcmp.eq.f32.partialorder %v1862_v0, 8.507059e+37 }
 0x3b1   : > { %2305 = vst.msk [vmem:[%s3747_s17] sm:$0xff] %vm1536_vm3, %v2273_v53  ;;  %v1856_v7 = vmul.f32 %v2966_v56, %v1855_v42  ;;  %v3764_v50 = vpop.eup %2969  ;;  %vm1846_vm1 = vmor %vm1844_vm14, %vm1845_vm10  ;;  %v1851_v30 = vor.u32 1.1754944e-38, %v1850_v44  ;;  %vm1849_vm2 = vcmp.eq.f32.partialorder %v1848_v54, 8.507059e+37  ;;  %v2342_v48 = vadd.s32 24, %v3726_v8 }
 0x3b2   : > { %v1842_v13 = vmul.f32 %v2968_v62, %v1841_v3  ;;  %2973 = vpow2.f32 %v1703_v5  ;;  %v1783_v21 = vsel %vm1536_vm3, %v3764_v50, 0.0  ;;  %v2500_v6 = vsel %vm2404_vm9, %v2273_v53, 0.0 }
 0x3b3   : > { %v1857_v18 = vadd.f32 %v2966_v56, %v1856_v7  ;;  %1784 = vadd.xlane.f32.xlu2 %v1783_v21  ;;  %v1878_v3 = vand.u32 2147483648, %v3751_v49  ;;  %v2532_v53 = vsel %vm1536_vm3, %v2500_v6, 0.0  ;;  %v2375_v0 = vadd.s32 %v3731_v19, %v2342_v48 }
 0x3b4   : > { %v1843_v24 = vadd.f32 %v2968_v62, %v1842_v13  ;;  %vm1872_vm5 = vweird.f32 %v3751_v49 }
 0x3b5   : > { %v2972_v28 = vpop.eup %2971  ;;  %v1861_v29 = vsel %vm1860_vm13, %v2966_v56, %v1857_v18  ;;  %v1599_v1 = vpop.xlane.xlu2 %1598  ;;  %v1879_v63 = vor.u32 1.1754944e-38, %v1878_v3  ;;  %vm2407_vm8 = vcmp.lt.s32.totalorder %v2375_v0, 1000 }
 0x3b6   : > { %v1866_v36 = vsel %vm1863_vm15, %v1865_v58, %v1861_v29  ;;  %v1847_v37 = vsel %vm1846_vm1, %v2968_v62, %v1843_v24  ;;  %v1868_v39 = vmul.f32 %v2972_v28, %v3751_v49  ;;  %v1653_v56 = vsub.f32 %v3611_v9, %v1599_v1 }
 0x3b7   : > { %v2275_v2 = vmul.f32 %v3591_v55, %v1866_v36  ;;  %v1852_v47 = vsel %vm1849_vm2, %v1851_v30, %v1847_v37  ;;  %vm1873_vm4 = vweird.f32 %v2972_v28  ;;  %v1876_v62 = vand.u32 2147483647, %v3751_v49 }
 0x3b8   : > { %v2274_v42 = vmul.f32 %v3588_v52, %v1852_v47  ;;  %v1869_v10 = vsub.f32 1.0, %v1868_v39  ;;  %v3778_v60 = vpop.eup %2973  ;;  %v1705_v55 = vmul.f32 1.442695, %v1653_v56  ;;  %vm1874_vm6 = vmor %vm1872_vm5, %vm1873_vm4  ;;  %v2344_v30 = vadd.s32 40, %v3726_v8 }
 0x3b9   : > { %2307 = vst.msk [vmem:[%s3747_s17 + $0x10] sm:$0xff] %vm1536_vm3, %v2275_v2  ;;  %v2502_v5 = vsel %vm2406_vm12, %v2275_v2, 0.0  ;;  %v1786_v52 = vsel %vm1536_vm3, %v3778_v60, 0.0  ;;  %vm1877_vm7 = vcmp.eq.f32.partialorder %v1876_v62, 8.507059e+37 }
 0x3ba   : > { %2306 = vst.msk [vmem:[%s3747_s17 + $0x8] sm:$0xff] %vm1536_vm3, %v2274_v42  ;;  %v2501_v9 = vsel %vm2405_vm0, %v2274_v42, 0.0  ;;  %v1870_v26 = vmul.f32 %v2972_v28, %v1869_v10  ;;  %2975 = vpow2.f32 %v1705_v55  ;;  %1787 = vadd.xlane.f32.xlu0 %v1786_v52  ;;  %v2535_v22 = vsel %vm1536_vm3, %v2502_v5, 0.0 }
 0x3bb   : > { %v2533_v7 = vsel %vm1536_vm3, %v2501_v9, 0.0  ;;  %v2343_v10 = vadd.s32 32, %v3726_v8 }
 0x3bc   : > { %v2534_v44 = vadd.f32 %v2533_v7, %v2532_v53  ;;  %v1871_v13 = vadd.f32 %v2972_v28, %v1870_v26 }
 0x3bd   : > { %v1746_v54 = vpop.xlane.xlu1 %1745  ;;  %v3796_v18 = vpop.xlane.xlu2 %1742  ;;  %v2376_v0 = vadd.s32 %v3731_v19, %v2343_v10 }
 0x3be   : > { %v2536_v21 = vadd.f32 %v2535_v22, %v2534_v44  ;;  %v1875_v58 = vsel %vm1874_vm6, %v2972_v28, %v1871_v13  ;;  %2977 = vrcp.f32 %v1746_v54  ;;  %v1602_v24 = vpop.xlane.xlu0 %1601  ;;  %v1904_v5 = vand.u32 2147483647, %v1746_v54 }
 0x3bf   : > { %v1880_v29 = vsel %vm1877_vm7, %v1879_v63, %v1875_v58  ;;  %2979 = vrcp.f32 %v3796_v18  ;;  %v1654_v36 = vsub.f32 %v3620_v17, %v1602_v24  ;;  %v1906_v9 = vand.u32 2147483648, %v1746_v54 }
 0x3c0   : > { %v2276_v49 = vmul.f32 %v3601_v46, %v1880_v29  ;;  %v3801_v1 = vpop.eup %2975  ;;  %v2377_v46 = vadd.s32 %v3731_v19, %v2344_v30  ;;  %v1892_v53 = vand.u32 2147483648, %v3796_v18  ;;  %v1890_v13 = vand.u32 2147483647, %v3796_v18 }
 0x3c1   : > { %v1789_v28 = vsel %vm1536_vm3, %v3801_v1, 0.0  ;;  %v1707_v2 = vmul.f32 1.442695, %v1654_v36  ;;  %vm1900_vm12 = vweird.f32 %v1746_v54  ;;  %v1907_v58 = vor.u32 1.1754944e-38, %v1906_v9 }
 0x3c2   : > { %2308 = vst.msk [vmem:[%s3747_s17 + $0x18] sm:$0xff] %vm1536_vm3, %v2276_v49  ;;  %v2503_v37 = vsel %vm2407_vm8, %v2276_v49, 0.0  ;;  %1790 = vadd.xlane.f32.xlu1 %v1789_v28  ;;  %vm2409_vm9 = vcmp.lt.s32.totalorder %v2377_v46, 1000  ;;  %vm1886_vm14 = vweird.f32 %v3796_v18  ;;  %vm1905_vm15 = vcmp.eq.f32.partialorder %v1904_v5, 8.507059e+37 }
 0x3c3   : > { %v2537_v39 = vsel %vm1536_vm3, %v2503_v37, 0.0  ;;  %2981 = vpow2.f32 %v1707_v2  ;;  %v1893_v30 = vor.u32 1.1754944e-38, %v1892_v53  ;;  %vm1891_vm1 = vcmp.eq.f32.partialorder %v1890_v13, 8.507059e+37 }
 0x3c4   : > { %v2978_v47 = vpop.eup %2977  ;;  %v3809_v48 = vadd.f32 %v2537_v39, %v2536_v21  ;;  %vm2408_vm2 = vcmp.lt.s32.totalorder %v2376_v0, 1000 }
 0x3c5   : > { %v2980_v56 = vpop.eup %2979  ;;  %v1896_v6 = vmul.f32 %v2978_v47, %v1746_v54  ;;  %v3812_v42 = vpop.xlane.xlu2 %1748  ;;  %vm1901_vm10 = vweird.f32 %v2978_v47 }
 0x3c6   : > { %v1605_v17 = vpop.xlane.xlu1 %1604  ;;  %v1882_v62 = vmul.f32 %v2980_v56, %v3796_v18  ;;  %2983 = vrcp.f32 %v3812_v42  ;;  %vm1887_vm11 = vweird.f32 %v2980_v56  ;;  %vm1902_vm13 = vmor %vm1900_vm12, %vm1901_vm10  ;;  %v1920_v10 = vand.u32 2147483648, %v3812_v42 }
 0x3c7   : > { %v1897_v3 = vsub.f32 1.0, %v1896_v6  ;;  %v1655_v55 = vsub.f32 %v3631_v25, %v1605_v17  ;;  %v2345_v25 = vadd.s32 48, %v3726_v8  ;;  %vm1888_vm0 = vmor %vm1886_vm14, %vm1887_vm11  ;;  %vm1914_vm5 = vweird.f32 %v3812_v42 }
 0x3c8   : > { %v1883_v26 = vsub.f32 1.0, %v1882_v62 }
 0x3c9   : > { %v1898_v52 = vmul.f32 %v2978_v47, %v1897_v3  ;;  %v1709_v7 = vmul.f32 1.442695, %v1655_v55  ;;  %v3821_v22 = vpop.eup %2981  ;;  %v2378_v17 = vadd.s32 %v3731_v19, %v2345_v25  ;;  %v1918_v55 = vand.u32 2147483647, %v3812_v42 }
 0x3ca   : > { %v1884_v44 = vmul.f32 %v2980_v56, %v1883_v26  ;;  %v1792_v29 = vsel %vm1536_vm3, %v3821_v22, 0.0 }
 0x3cb   : > { %v1899_v63 = vadd.f32 %v2978_v47, %v1898_v52  ;;  %2985 = vpow2.f32 %v1709_v7  ;;  %1793 = vadd.xlane.f32.xlu2 %v1792_v29  ;;  %vm2410_vm6 = vcmp.lt.s32.totalorder %v2378_v17, 1000  ;;  %v1921_v7 = vor.u32 1.1754944e-38, %v1920_v10 }
 0x3cc   : > { %v2984_v21 = vpop.eup %2983  ;;  %v1885_v24 = vadd.f32 %v2980_v56, %v1884_v44  ;;  %vm1919_vm8 = vcmp.eq.f32.partialorder %v1918_v55, 8.507059e+37 }
 0x3cd   : > { %v1903_v49 = vsel %vm1902_vm13, %v2978_v47, %v1899_v63  ;;  %v1910_v36 = vmul.f32 %v2984_v21, %v3812_v42  ;;  %v3829_v54 = vpop.xlane.xlu0 %1751  ;;  %v1608_v37 = vpop.xlane.xlu2 %1607  ;;  %vm1915_vm4 = vweird.f32 %v2984_v21 }
 0x3ce   : > { %v1908_v28 = vsel %vm1905_vm15, %v1907_v58, %v1903_v49  ;;  %v1889_v39 = vsel %vm1888_vm0, %v2980_v56, %v1885_v24  ;;  %2987 = vrcp.f32 %v3829_v54  ;;  %v1656_v62 = vsub.f32 %v3640_v33, %v1608_v37  ;;  %vm1916_vm7 = vmor %vm1914_vm5, %vm1915_vm4 }
 0x3cf   : > { %v2278_v18 = vmul.f32 %v3618_v15, %v1908_v28  ;;  %v1894_v2 = vsel %vm1891_vm1, %v1893_v30, %v1889_v39  ;;  %v1911_v47 = vsub.f32 1.0, %v1910_v36  ;;  %v2346_v58 = vadd.s32 56, %v3726_v8 }
 0x3d0   : > { %v2277_v6 = vmul.f32 %v3615_v12, %v1894_v2  ;;  %v1711_v12 = vmul.f32 1.442695, %v1656_v62  ;;  %v1934_v29 = vand.u32 2147483648, %v3829_v54  ;;  %v1932_v36 = vand.u32 2147483647, %v3829_v54 }
 0x3d1   : > { %v3837_v3 = vpop.eup %2985  ;;  %2310 = vst.msk [vmem:[%s3747_s17 + $0x28] sm:$0xff] %vm1536_vm3, %v2278_v18  ;;  %v1912_v56 = vmul.f32 %v2984_v21, %v1911_v47  ;;  %v2505_v15 = vsel %vm2409_vm9, %v2278_v18, 0.0  ;;  %v2379_v39 = vadd.s32 %v3731_v19, %v2346_v58  ;;  %vm1928_vm10 = vweird.f32 %v3829_v54 }
 0x3d2   : > { %2309 = vst.msk [vmem:[%s3747_s17 + $0x20] sm:$0xff] %vm1536_vm3, %v2277_v6  ;;  %v2504_v5 = vsel %vm2408_vm2, %v2277_v6, 0.0  ;;  %v1795_v33 = vsel %vm1536_vm3, %v3837_v3, 0.0  ;;  %2989 = vpow2.f32 %v1711_v12  ;;  %v2541_v46 = vsel %vm1536_vm3, %v2505_v15, 0.0 }
 0x3d3   : > { %v2539_v9 = vsel %vm1536_vm3, %v2504_v5, 0.0  ;;  %v1913_v26 = vadd.f32 %v2984_v21, %v1912_v56  ;;  %1796 = vadd.xlane.f32.xlu0 %v1795_v33  ;;  %v1935_v6 = vor.u32 1.1754944e-38, %v1934_v29  ;;  %vm1933_vm12 = vcmp.eq.f32.partialorder %v1932_v36, 8.507059e+37 }
 0x3d4   : > { %v2988_v52 = vpop.eup %2987  ;;  %v2540_v53 = vadd.f32 %v2539_v9, %v3809_v48  ;;  %vm2411_vm13 = vcmp.lt.s32.totalorder %v2379_v39, 1000  ;;  %v2347_v15 = vadd.s32 64, %v3726_v8 }
 0x3d5   : > { %v1917_v0 = vsel %vm1916_vm7, %v2984_v21, %v1913_v26  ;;  %v1924_v44 = vmul.f32 %v2988_v52, %v3829_v54  ;;  %v1755_v13 = vpop.xlane.xlu1 %1754  ;;  %v1611_v42 = vpop.xlane.xlu0 %1610  ;;  %vm1929_vm9 = vweird.f32 %v2988_v52 }
 0x3d6   : > { %v2542_v63 = vadd.f32 %v2541_v46, %v2540_v53  ;;  %v1922_v25 = vsel %vm1919_vm8, %v1921_v7, %v1917_v0  ;;  %2991 = vrcp.f32 %v1755_v13  ;;  %v1657_v49 = vsub.f32 %v3649_v41, %v1611_v42  ;;  %vm1930_vm11 = vmor %vm1928_vm10, %vm1929_vm9 }
 0x3d7   : > { %v2279_v48 = vmul.f32 %v3629_v23, %v1922_v25  ;;  %v1925_v24 = vsub.f32 1.0, %v1924_v44  ;;  %v1946_v9 = vand.u32 2147483647, %v1755_v13  ;;  %v1948_v26 = vand.u32 2147483648, %v1755_v13 }
 0x3d8   : > { %v3860_v37 = vpop.eup %2989  ;;  %v1713_v23 = vmul.f32 1.442695, %v1657_v49  ;;  %v2380_v0 = vadd.s32 %v3731_v19, %v2347_v15  ;;  %vm1942_vm15 = vweird.f32 %v1755_v13 }
 0x3d9   : > { %2311 = vst.msk [vmem:[%s3747_s17 + $0x30] sm:$0xff] %vm1536_vm3, %v2279_v48  ;;  %v2506_v21 = vsel %vm2410_vm6, %v2279_v48, 0.0  ;;  %v1926_v30 = vmul.f32 %v2988_v52, %v1925_v24  ;;  %v1798_v41 = vsel %vm1536_vm3, %v3860_v37, 0.0  ;;  %vm1947_vm1 = vcmp.eq.f32.partialorder %v1946_v9, 8.507059e+37 }
 0x3da   : > { %v2543_v28 = vsel %vm1536_vm3, %v2506_v21, 0.0  ;;  %2993 = vpow2.f32 %v1713_v23  ;;  %1799 = vadd.xlane.f32.xlu1 %v1798_v41  ;;  %vm2412_vm2 = vcmp.lt.s32.totalorder %v2380_v0, 1000 }
 0x3db   : > { %v2544_v18 = vadd.f32 %v2543_v28, %v2542_v63  ;;  %v1927_v2 = vadd.f32 %v2988_v52, %v1926_v30  ;;  %v1949_v63 = vor.u32 1.1754944e-38, %v1948_v26 }
 0x3dc   : > { %v2992_v47 = vpop.eup %2991 }
 0x3dd   : > { %v1931_v17 = vsel %vm1930_vm11, %v2988_v52, %v1927_v2  ;;  %v1938_v10 = vmul.f32 %v2992_v47, %v1755_v13  ;;  %v1758_v62 = vpop.xlane.xlu2 %1757  ;;  %v1614_v56 = vpop.xlane.xlu1 %1613  ;;  %vm1943_vm14 = vweird.f32 %v2992_v47  ;;  %v2348_v13 = vadd.s32 72, %v3726_v8 }
 0x3de   : > { %v1936_v55 = vsel %vm1933_vm12, %v1935_v6, %v1931_v17  ;;  %2995 = vrcp.f32 %v1758_v62  ;;  %v1658_v12 = vsub.f32 %v3658_v51, %v1614_v56  ;;  %vm1944_vm0 = vmor %vm1942_vm15, %vm1943_vm14  ;;  %v1960_v36 = vand.u32 2147483647, %v1758_v62 }
 0x3df   : > { %v2280_v54 = vmul.f32 %v3638_v31, %v1936_v55  ;;  %v1939_v5 = vsub.f32 1.0, %v1938_v10  ;;  %v1962_v28 = vand.u32 2147483648, %v1758_v62  ;;  %vm1956_vm5 = vweird.f32 %v1758_v62 }
 0x3e0   : > { %v1715_v53 = vmul.f32 1.442695, %v1658_v12  ;;  %v3872_v7 = vpop.eup %2993  ;;  %vm1961_vm7 = vcmp.eq.f32.partialorder %v1960_v36, 8.507059e+37 }
 0x3e1   : > { %2312 = vst.msk [vmem:[%s3747_s17 + $0x38] sm:$0xff] %vm1536_vm3, %v2280_v54  ;;  %v2507_v33 = vsel %vm2411_vm13, %v2280_v54, 0.0  ;;  %v1940_v52 = vmul.f32 %v2992_v47, %v1939_v5  ;;  %v1801_v51 = vsel %vm1536_vm3, %v3872_v7, 0.0  ;;  %v1963_v10 = vor.u32 1.1754944e-38, %v1962_v28 }
 0x3e2   : > { %v2545_v46 = vsel %vm1536_vm3, %v2507_v33, 0.0  ;;  %2997 = vpow2.f32 %v1715_v53  ;;  %1802 = vadd.xlane.f32.xlu2 %v1801_v51  ;;  %v2349_v5 = vadd.s32 80, %v3726_v8 }
 0x3e3   : > { %v2546_v44 = vadd.f32 %v2545_v46, %v2544_v18  ;;  %v1941_v31 = vadd.f32 %v2992_v47, %v1940_v52 }
 0x3e4   : > { %v2996_v42 = vpop.eup %2995 }
 0x3e5   : > { %v1945_v25 = vsel %vm1944_vm0, %v2992_v47, %v1941_v31  ;;  %v1952_v58 = vmul.f32 %v2996_v42, %v1758_v62  ;;  %v1761_v48 = vpop.xlane.xlu0 %1760  ;;  %v1617_v24 = vpop.xlane.xlu2 %1616  ;;  %vm1957_vm4 = vweird.f32 %v2996_v42  ;;  %v2381_v47 = vadd.s32 %v3731_v19, %v2348_v13 }
 0x3e6   : > { %v1950_v29 = vsel %vm1947_vm1, %v1949_v63, %v1945_v25  ;;  %2999 = vrcp.f32 %v1761_v48  ;;  %v1659_v30 = vsub.f32 %v3666_v59, %v1617_v24  ;;  %vm1958_vm6 = vmor %vm1956_vm5, %vm1957_vm4  ;;  %v1976_v62 = vand.u32 2147483648, %v1761_v48 }
 0x3e7   : > { %v2281_v49 = vmul.f32 %v3647_v34, %v1950_v29  ;;  %v1953_v21 = vsub.f32 1.0, %v1952_v58  ;;  %vm2413_vm8 = vcmp.lt.s32.totalorder %v2381_v47, 1000  ;;  %v1974_v0 = vand.u32 2147483647, %v1761_v48 }
 0x3e8   : > { %v3881_v39 = vpop.eup %2997  ;;  %v1717_v2 = vmul.f32 1.442695, %v1659_v30  ;;  %v2382_v31 = vadd.s32 %v3731_v19, %v2349_v5  ;;  %vm1970_vm10 = vweird.f32 %v1761_v48 }
 0x3e9   : > { %2313 = vst.msk [vmem:[%s3747_s17 + $0x40] sm:$0xff] %vm1536_vm3, %v2281_v49  ;;  %v2508_v23 = vsel %vm2412_vm2, %v2281_v49, 0.0  ;;  %v1954_v18 = vmul.f32 %v2996_v42, %v1953_v21  ;;  %v1804_v34 = vsel %vm1536_vm3, %v3881_v39, 0.0  ;;  %vm1975_vm12 = vcmp.eq.f32.partialorder %v1974_v0, 8.507059e+37 }
 0x3ea   : > { %v2547_v41 = vsel %vm1536_vm3, %v2508_v23, 0.0  ;;  %3001 = vpow2.f32 %v1717_v2  ;;  %1805 = vadd.xlane.f32.xlu0 %v1804_v34  ;;  %vm2414_vm13 = vcmp.lt.s32.totalorder %v2382_v31, 1000  ;;  %v2354_v0 = vadd.s32 120, %v3726_v8 }
 0x3eb   : > { %v2548_v6 = vadd.f32 %v2547_v41, %v2546_v44  ;;  %v1955_v17 = vadd.f32 %v2996_v42, %v1954_v18 }
 0x3ec   : > { %v3000_v59 = vpop.eup %2999 }
 0x3ed   : > { %v1959_v56 = vsel %vm1958_vm6, %v2996_v42, %v1955_v17  ;;  %v1966_v55 = vmul.f32 %v3000_v59, %v1761_v48  ;;  %v1620_v15 = vpop.xlane.xlu0 %1619  ;;  %vm1971_vm9 = vweird.f32 %v3000_v59  ;;  %v1977_v42 = vor.u32 1.1754944e-38, %v1976_v62 }
 0x3ee   : > { %v1964_v54 = vsel %vm1961_vm7, %v1963_v10, %v1959_v56  ;;  %v1660_v12 = vsub.f32 %v3672_v61, %v1620_v15  ;;  %vm1972_vm11 = vmor %vm1970_vm10, %vm1971_vm9 }
 0x3ef   : > { %v2282_v9 = vmul.f32 %v3656_v38, %v1964_v54  ;;  %v1967_v26 = vsub.f32 1.0, %v1966_v55  ;;  %v2351_v55 = vadd.s32 96, %v3726_v8 }
 0x3f0   : > { %v1719_v33 = vmul.f32 1.442695, %v1660_v12  ;;  %v3892_v52 = vpop.eup %3001 }
 0x3f1   : > { %2314 = vst.msk [vmem:[%s3747_s17 + $0x48] sm:$0xff] %vm1536_vm3, %v2282_v9  ;;  %v2509_v53 = vsel %vm2413_vm8, %v2282_v9, 0.0  ;;  %v1968_v46 = vmul.f32 %v3000_v59, %v1967_v26  ;;  %v1807_v61 = vsel %vm1536_vm3, %v3892_v52, 0.0  ;;  %v3930_v26 = vadd.s32 %v3731_v19, %v2351_v55 }
 0x3f2   : > { %v2549_v44 = vsel %vm1536_vm3, %v2509_v53, 0.0  ;;  %3003 = vpow2.f32 %v1719_v33  ;;  %1808 = vadd.xlane.f32.xlu1 %v1807_v61 }
 0x3f3   : > { %v2550_v38 = vadd.f32 %v2549_v44, %v2548_v6  ;;  %v1969_v51 = vadd.f32 %v3000_v59, %v1968_v46  ;;  %vm2416_vm2 = vcmp.lt.s32.totalorder %v3930_v26, 1000 }
 0x3f5   : > { %v1973_v63 = vsel %vm1972_vm11, %v3000_v59, %v1969_v51  ;;  %v1623_v25 = vpop.xlane.xlu0 %1622 }
 0x3f6   : > { %v1978_v58 = vsel %vm1975_vm12, %v1977_v42, %v1973_v63  ;;  %v1661_v24 = vsub.f32 %v3677_v4, %v1623_v25  ;;  %v2350_v63 = vadd.s32 88, %v3726_v8 }
 0x3f7   : > { %v2283_v29 = vmul.f32 %v3664_v57, %v1978_v58 }
 0x3f8   : > { %v3902_v13 = vpop.eup %3003  ;;  %v1721_v49 = vmul.f32 1.442695, %v1661_v24 }
 0x3f9   : > { %2315 = vst.msk [vmem:[%s3747_s17 + $0x50] sm:$0xff] %vm1536_vm3, %v2283_v29  ;;  %v2510_v21 = vsel %vm2414_vm13, %v2283_v29, 0.0  ;;  %v1810_v48 = vsel %vm1536_vm3, %v3902_v13, 0.0 }
 0x3fa   : > { %v2551_v30 = vsel %vm1536_vm3, %v2510_v21, 0.0  ;;  %3005 = vpow2.f32 %v1721_v49  ;;  %1811 = vadd.xlane.f32.xlu2 %v1810_v48 }
 0x3fb   : > { %v3909_v36 = vadd.f32 %v2551_v30, %v2550_v38 }
 0x3fd   : > { %v1626_v28 = vpop.xlane.xlu2 %1625 }
 0x3fe   : > { %v1662_v4 = vsub.f32 %v3682_v11, %v1626_v28 }
 0x400   : > { %v3912_v23 = vpop.eup %3005  ;;  %v1723_v57 = vmul.f32 1.442695, %v1662_v4  ;;  %v2383_v4 = vadd.s32 %v3731_v19, %v2350_v63 }
 0x401   : > { %v1813_v18 = vsel %vm1536_vm3, %v3912_v23, 0.0 }
 0x402   : > { %3007 = vpow2.f32 %v1723_v57  ;;  %1814 = vadd.xlane.f32.xlu0 %v1813_v18  ;;  %vm2415_vm12 = vcmp.lt.s32.totalorder %v2383_v4, 1000 }
 0x405   : > { %v1767_v2 = vpop.xlane.xlu2 %1766  ;;  %v1629_v41 = vpop.xlane.xlu1 %1628 }
 0x406   : > { %3009 = vrcp.f32 %v1767_v2  ;;  %v1663_v47 = vsub.f32 %v3690_v14, %v1629_v41  ;;  %v2004_v14 = vand.u32 2147483648, %v1767_v2  ;;  %v2002_v12 = vand.u32 2147483647, %v1767_v2 }
 0x407   : > { %vm1998_vm15 = vweird.f32 %v1767_v2  ;;  %v2352_v41 = vadd.s32 104, %v3726_v8 }
 0x408   : > { %v3917_v34 = vpop.eup %3007  ;;  %v1725_v6 = vmul.f32 1.442695, %v1663_v47  ;;  %v2005_v46 = vor.u32 1.1754944e-38, %v2004_v14  ;;  %vm2003_vm1 = vcmp.eq.f32.partialorder %v2002_v12, 8.507059e+37 }
 0x409   : > { %v1816_v17 = vsel %vm1536_vm3, %v3917_v34, 0.0 }
 0x40a   : > { %1817 = vadd.xlane.f32.xlu1 %v1816_v17  ;;  %3011 = vpow2.f32 %v1725_v6 }
 0x40c   : > { %v3010_v11 = vpop.eup %3009 }
 0x40d   : > { %v1994_v59 = vmul.f32 %v3010_v11, %v1767_v2  ;;  %v1776_v10 = vpop.xlane.xlu2 %1775  ;;  %v3921_v56 = vpop.xlane.xlu1 %1763  ;;  %vm1999_vm14 = vweird.f32 %v3010_v11  ;;  %v2353_v2 = vadd.s32 112, %v3726_v8 }
 0x40e   : > { %3013 = vrcp.f32 %v1776_v10  ;;  %vm2000_vm0 = vmor %vm1998_vm15, %vm1999_vm14  ;;  %v2046_v49 = vand.u32 2147483648, %v1776_v10  ;;  %v2044_v30 = vand.u32 2147483647, %v1776_v10  ;;  %v1990_v28 = vand.u32 2147483648, %v3921_v56 }
 0x40f   : > { %v1995_v15 = vsub.f32 1.0, %v1994_v59  ;;  %3015 = vrcp.f32 %v3921_v56  ;;  %vm2040_vm6 = vweird.f32 %v1776_v10  ;;  %vm1984_vm8 = vweird.f32 %v3921_v56 }
 0x410   : > { %v3925_v54 = vpop.eup %3011  ;;  %v2047_v6 = vor.u32 1.1754944e-38, %v2046_v49  ;;  %vm2045_vm9 = vcmp.eq.f32.partialorder %v2044_v30, 8.507059e+37  ;;  %v1991_v55 = vor.u32 1.1754944e-38, %v1990_v28 }
 0x411   : > { %v1996_v5 = vmul.f32 %v3010_v11, %v1995_v15  ;;  %v1819_v9 = vsel %vm1536_vm3, %v3925_v54, 0.0 }
 0x412   : > { %1820 = vadd.xlane.f32.xlu2 %v1819_v9 }
 0x413   : > { %v1997_v62 = vadd.f32 %v3010_v11, %v1996_v5  ;;  %v1632_v33 = vpop.xlane.xlu0 %1631 }
 0x414   : > { %v3014_v53 = vpop.eup %3013  ;;  %v1664_v44 = vsub.f32 %v3708_v45, %v1632_v33  ;;  %v3942_v45 = vadd.s32 %v3731_v19, %v2354_v0  ;;  %v3966_v33 = vadd.s32 %v3731_v19, %v2353_v2  ;;  %v3970_v0 = vadd.s32 %v3731_v19, %v2352_v41 }
 0x415   : > { %v3016_v31 = vpop.eup %3015  ;;  %v2001_v61 = vsel %vm2000_vm0, %v3010_v11, %v1997_v62  ;;  %v2036_v38 = vmul.f32 %v3014_v53, %v1776_v10  ;;  %v3934_v51 = vpop.xlane.xlu1 %1772  ;;  %vm2041_vm4 = vweird.f32 %v3014_v53  ;;  %v2356_v10 = vadd.s32 136, %v3726_v8 }
 0x416   : > { %v2006_v42 = vsel %vm2003_vm1, %v2005_v46, %v2001_v61  ;;  %v1980_v25 = vmul.f32 %v3016_v31, %v3921_v56  ;;  %v1727_v58 = vmul.f32 1.442695, %v1664_v44  ;;  %3017 = vrcp.f32 %v3934_v51  ;;  %vm2042_vm7 = vmor %vm2040_vm6, %vm2041_vm4 }
 0x417   : > { %v2285_v24 = vmul.f32 %v3686_v20, %v2006_v42  ;;  %v2037_v29 = vsub.f32 1.0, %v2036_v38  ;;  %vm1985_vm5 = vweird.f32 %v3016_v31  ;;  %v1988_v20 = vand.u32 2147483647, %v3921_v56 }
 0x418   : > { %v1981_v21 = vsub.f32 1.0, %v1980_v25  ;;  %3019 = vpow2.f32 %v1727_v58  ;;  %vm1986_vm10 = vmor %vm1984_vm8, %vm1985_vm5  ;;  %vm2419_vm13 = vcmp.lt.s32.totalorder %v3942_v45, 1000  ;;  %v2032_v44 = vand.u32 2147483648, %v3934_v51 }
 0x419   : > { %2317 = vst.msk [vmem:[%s3747_s17 + $0x60] sm:$0xff] %vm1536_vm3, %v2285_v24  ;;  %v2038_v48 = vmul.f32 %v3014_v53, %v2037_v29  ;;  %vm1989_vm11 = vcmp.eq.f32.partialorder %v1988_v20, 8.507059e+37  ;;  %v2512_v38 = vsel %vm2416_vm2, %v2285_v24, 0.0  ;;  %vm2418_vm15 = vcmp.lt.s32.totalorder %v3966_v33, 1000 }
 0x41a   : > { %v1982_v57 = vmul.f32 %v3016_v31, %v1981_v21  ;;  %vm2026_vm0 = vweird.f32 %v3934_v51  ;;  %v2355_v29 = vadd.s32 128, %v3726_v8  ;;  %vm2417_vm1 = vcmp.lt.s32.totalorder %v3970_v0, 1000 }
 0x41b   : > { %v2039_v18 = vadd.f32 %v3014_v53, %v2038_v48  ;;  %v3951_v47 = vpop.xlane.xlu0 %1769  ;;  %v2357_v21 = vadd.s32 144, %v3726_v8  ;;  %v2555_v48 = vsel %vm1536_vm3, %v2512_v38, 0.0 }
 0x41c   : > { %v1983_v17 = vadd.f32 %v3016_v31, %v1982_v57  ;;  %3021 = vrcp.f32 %v3951_v47  ;;  %v3018_v11 = vpop.eup %3017  ;;  %v2016_v20 = vand.u32 2147483647, %v3951_v47  ;;  %vm2012_vm6 = vweird.f32 %v3951_v47 }
 0x41d   : > { %v2043_v59 = vsel %vm2042_vm7, %v3014_v53, %v2039_v18  ;;  %v2022_v12 = vmul.f32 %v3018_v11, %v3934_v51  ;;  %v3960_v9 = vpop.xlane.xlu1 %1781  ;;  %vm2027_vm14 = vweird.f32 %v3018_v11 }
 0x41e   : > { %v3957_v15 = vpop.eup %3019  ;;  %v2048_v14 = vsel %vm2045_vm9, %v2047_v6, %v2043_v59  ;;  %v1987_v5 = vsel %vm1986_vm10, %v3016_v31, %v1983_v17  ;;  %3023 = vrcp.f32 %v3960_v9  ;;  %v3980_v31 = vadd.s32 %v3731_v19, %v2356_v10  ;;  %vm2028_vm2 = vmor %vm2026_vm0, %vm2027_vm14 }
 0x41f   : > { %v3963_v56 = vmul.f32 %v3699_v35, %v2048_v14  ;;  %v1992_v62 = vsel %vm1989_vm11, %v1991_v55, %v1987_v5  ;;  %v2023_v46 = vsub.f32 1.0, %v2022_v12  ;;  %v2030_v35 = vand.u32 2147483647, %v3934_v51 }
 0x420   : > { %v2284_v53 = vmul.f32 %v3697_v32, %v1992_v62  ;;  %v1822_v32 = vsel %vm1536_vm3, %v3957_v15, 0.0  ;;  %v2033_v51 = vor.u32 1.1754944e-38, %v2032_v44  ;;  %v2072_v59 = vand.u32 2147483647, %v3960_v9 }
 0x421   : > { %2320 = vst.msk [vmem:[%s3747_s17 + $0x78] sm:$0xff] %vm1536_vm3, %v3963_v56  ;;  %v2024_v63 = vmul.f32 %v3018_v11, %v2023_v46  ;;  %1823 = vadd.xlane.f32.xlu0 %v1822_v32  ;;  %vm2031_vm4 = vcmp.eq.f32.partialorder %v2030_v35, 8.507059e+37  ;;  %v4009_v55 = vadd.s32 %v3731_v19, %v2355_v29  ;;  %v2074_v14 = vand.u32 2147483648, %v3960_v9 }
 0x422   : > { %v3022_v61 = vpop.eup %3021  ;;  %2316 = vst.msk [vmem:[%s3747_s17 + $0x58] sm:$0xff] %vm1536_vm3, %v2284_v53  ;;  %v2511_v42 = vsel %vm2415_vm12, %v2284_v53, 0.0  ;;  %vm2017_vm8 = vcmp.eq.f32.partialorder %v2016_v20, 8.507059e+37  ;;  %vm2068_vm9 = vweird.f32 %v3960_v9  ;;  %vm4024_vm11 = vcmp.eq.f32.partialorder %v2072_v59, 8.507059e+37 }
 0x423   : > { %v2553_v25 = vsel %vm1536_vm3, %v2511_v42, 0.0  ;;  %v2008_v58 = vmul.f32 %v3022_v61, %v3951_v47  ;;  %v3994_v49 = vpop.xlane.xlu0 %1778  ;;  %v2025_v24 = vadd.f32 %v3018_v11, %v2024_v63  ;;  %vm2013_vm5 = vweird.f32 %v3022_v61 }
 0x424   : > { %v2554_v26 = vadd.f32 %v2553_v25, %v3909_v36  ;;  %3025 = vrcp.f32 %v3994_v49  ;;  %v3024_v28 = vpop.eup %3023  ;;  %v2018_v36 = vand.u32 2147483648, %v3951_v47  ;;  %vm2014_vm7 = vmor %vm2012_vm6, %vm2013_vm5  ;;  %v2515_v47 = vsel %vm2419_vm13, %v3963_v56, 0.0 }
 0x425   : > { %v2009_v30 = vsub.f32 1.0, %v2008_v58  ;;  %v2029_v4 = vsel %vm2028_vm2, %v3018_v11, %v2025_v24  ;;  %v2064_v41 = vmul.f32 %v3024_v28, %v3960_v9  ;;  %vm2069_vm10 = vweird.f32 %v3024_v28 }
 0x426   : > { %v2556_v57 = vadd.f32 %v2555_v48, %v2554_v26  ;;  %v2034_v18 = vsel %vm2031_vm4, %v2033_v51, %v2029_v4  ;;  %v4004_v6 = vpop.xlane.xlu2 %1784  ;;  %v2019_v12 = vor.u32 1.1754944e-38, %v2018_v36  ;;  %v2058_v32 = vand.u32 2147483647, %v3994_v49  ;;  %vm2070_vm12 = vmor %vm2068_vm9, %vm2069_vm10 }
 0x427   : > { %v2010_v2 = vmul.f32 %v3022_v61, %v2009_v30  ;;  %v2287_v17 = vmul.f32 %v3706_v43, %v2034_v18  ;;  %3027 = vrcp.f32 %v4004_v6  ;;  %v2065_v10 = vsub.f32 1.0, %v2064_v41 }
 0x428   : > { %v4018_v43 = vadd.s32 %v3731_v19, %v2357_v21  ;;  %vm2054_vm13 = vweird.f32 %v3994_v49  ;;  %v2060_v45 = vand.u32 2147483648, %v3994_v49  ;;  %v2086_v20 = vand.u32 2147483647, %v4004_v6 }
 0x429   : > { %v2011_v11 = vadd.f32 %v3022_v61, %v2010_v2  ;;  %2319 = vst.msk [vmem:[%s3747_s17 + $0x70] sm:$0xff] %vm1536_vm3, %v2287_v17  ;;  %v2066_v53 = vmul.f32 %v3024_v28, %v2065_v10  ;;  %v2514_v58 = vsel %vm2418_vm15, %v2287_v17, 0.0  ;;  %vm4046_vm15 = vcmp.eq.f32.partialorder %v2058_v32, 8.507059e+37 }
 0x42a   : > { %v3026_v5 = vpop.eup %3025  ;;  %v2061_v4 = vor.u32 1.1754944e-38, %v2060_v45  ;;  %v2088_v36 = vand.u32 2147483648, %v4004_v6  ;;  %vm2421_vm2 = vcmp.lt.s32.totalorder %v3980_v31, 1000  ;;  %vm2420_vm4 = vcmp.lt.s32.totalorder %v4009_v55, 1000 }
 0x42b   : > { %v2015_v62 = vsel %vm2014_vm7, %v3022_v61, %v2011_v11  ;;  %v2050_v46 = vmul.f32 %v3026_v5, %v3994_v49  ;;  %v2067_v42 = vadd.f32 %v3024_v28, %v2066_v53  ;;  %v2075_v61 = vor.u32 1.1754944e-38, %v2074_v14 }
 0x42c   : > { %v2020_v35 = vsel %vm2017_vm8, %v2019_v12, %v2015_v62  ;;  %vm2055_vm14 = vweird.f32 %v3026_v5  ;;  %vm2082_vm5 = vweird.f32 %v4004_v6  ;;  %vm2422_vm6 = vcmp.lt.s32.totalorder %v4018_v43, 1000 }
 0x42d   : > { %v2286_v38 = vmul.f32 %v3715_v40, %v2020_v35  ;;  %v2051_v63 = vsub.f32 1.0, %v2050_v46  ;;  %v3028_v25 = vpop.eup %3027  ;;  %v4036_v56 = vpop.xlane.xlu0 %1787  ;;  %v2071_v29 = vsel %vm2070_vm12, %v3024_v28, %v2067_v42  ;;  %v2559_v28 = vsel %vm1536_vm3, %v2514_v58, 0.0  ;;  %vm2056_vm0 = vmor %vm2054_vm13, %vm2055_vm14 }
 0x42e   : > { %v2078_v33 = vmul.f32 %v3028_v25, %v4004_v6  ;;  %v2076_v24 = vsel %vm4024_vm11, %v2075_v61, %v2071_v29  ;;  %3029 = vrcp.f32 %v4036_v56  ;;  %vm2087_vm8 = vcmp.eq.f32.partialorder %v2086_v20, 8.507059e+37 }
 0x42f   : > { %2318 = vst.msk [vmem:[%s3747_s17 + $0x68] sm:$0xff] %vm1536_vm3, %v2286_v38  ;;  %v2513_v40 = vsel %vm2417_vm1, %v2286_v38, 0.0  ;;  %v2052_v26 = vmul.f32 %v3026_v5, %v2051_v63  ;;  %v2290_v0 = vmul.f32 %v3729_v16, %v2076_v24  ;;  %vm2083_vm1 = vweird.f32 %v3028_v25 }
 0x430   : > { %v2557_v9 = vsel %vm1536_vm3, %v2513_v40, 0.0  ;;  %v2079_v30 = vsub.f32 1.0, %v2078_v33  ;;  %v2561_v16 = vsel %vm1536_vm3, %v2515_v47, 0.0  ;;  %vm2084_vm7 = vmor %vm2082_vm5, %vm2083_vm1  ;;  %v2089_v10 = vor.u32 1.1754944e-38, %v2088_v36 }
 0x431   : > { %v2558_v48 = vadd.f32 %v2557_v9, %v2556_v57  ;;  %v2053_v51 = vadd.f32 %v3026_v5, %v2052_v26  ;;  %2322 = vst.msk [vmem:[%s3747_s17 + $0x88] sm:$0xff] %vm1536_vm3, %v2290_v0  ;;  %v2517_v31 = vsel %vm2421_vm2, %v2290_v0, 0.0  ;;  %v2358_v6 = vadd.s32 152, %v3726_v8 }
 0x432   : > { %v2080_v57 = vmul.f32 %v3028_v25, %v2079_v30  ;;  %v2565_v35 = vsel %vm1536_vm3, %v2517_v31, 0.0  ;;  %v2100_v44 = vand.u32 2147483647, %v4036_v56  ;;  %v2102_v32 = vand.u32 2147483648, %v4036_v56 }
 0x433   : > { %v2560_v18 = vadd.f32 %v2559_v28, %v2558_v48  ;;  %v2057_v2 = vsel %vm2056_vm0, %v3026_v5, %v2053_v51  ;;  %vm2096_vm10 = vweird.f32 %v4036_v56  ;;  %v2359_v33 = vadd.s32 160, %v3726_v8 }
 0x434   : > { %v2062_v49 = vsel %vm4046_vm15, %v2061_v4, %v2057_v2  ;;  %v2081_v59 = vadd.f32 %v3028_v25, %v2080_v57  ;;  %v3030_v11 = vpop.eup %3029  ;;  %v2103_v40 = vor.u32 1.1754944e-38, %v2102_v32  ;;  %vm2101_vm12 = vcmp.eq.f32.partialorder %v2100_v44, 8.507059e+37 }
 0x435   : > { %v2562_v41 = vadd.f32 %v2561_v16, %v2560_v18  ;;  %v2289_v17 = vmul.f32 %v3736_v27, %v2062_v49  ;;  %v1791_v14 = vpop.xlane.xlu1 %1790  ;;  %v2092_v12 = vmul.f32 %v3030_v11, %v4036_v56  ;;  %vm2097_vm9 = vweird.f32 %v3030_v11 }
 0x436   : > { %v2085_v5 = vsel %vm2084_vm7, %v3028_v25, %v2081_v59  ;;  %3031 = vrcp.f32 %v1791_v14  ;;  %v2391_v25 = vadd.s32 %v3731_v19, %v2358_v6  ;;  %vm2098_vm11 = vmor %vm2096_vm10, %vm2097_vm9  ;;  %v2116_v48 = vand.u32 2147483648, %v1791_v14 }
 0x437   : > { %2321 = vst.msk [vmem:[%s3747_s17 + $0x80] sm:$0xff] %vm1536_vm3, %v2289_v17  ;;  %v2516_v55 = vsel %vm2420_vm4, %v2289_v17, 0.0  ;;  %v2090_v62 = vsel %vm2087_vm8, %v2089_v10, %v2085_v5  ;;  %v2093_v47 = vsub.f32 1.0, %v2092_v12  ;;  %v2114_v51 = vand.u32 2147483647, %v1791_v14 }
 0x438   : > { %v2563_v27 = vsel %vm1536_vm3, %v2516_v55, 0.0  ;;  %v2291_v46 = vmul.f32 %v3764_v50, %v2090_v62  ;;  %vm2423_vm13 = vcmp.lt.s32.totalorder %v2391_v25, 1000  ;;  %v2392_v28 = vadd.s32 %v3731_v19, %v2359_v33 }
 0x439   : > { %v2564_v53 = vadd.f32 %v2563_v27, %v2562_v41  ;;  %v2094_v61 = vmul.f32 %v3030_v11, %v2093_v47  ;;  %vm2110_vm15 = vweird.f32 %v1791_v14  ;;  %v2117_v36 = vor.u32 1.1754944e-38, %v2116_v48 }
 0x43a   : > { %2323 = vst.msk [vmem:[%s3747_s17 + $0x90] sm:$0xff] %vm1536_vm3, %v2291_v46  ;;  %v2518_v38 = vsel %vm2422_vm6, %v2291_v46, 0.0  ;;  %vm2115_vm1 = vcmp.eq.f32.partialorder %v2114_v51, 8.507059e+37  ;;  %vm2424_vm2 = vcmp.lt.s32.totalorder %v2392_v28, 1000  ;;  %v2360_v41 = vadd.s32 168, %v3726_v8 }
 0x43b   : > { %v2566_v42 = vadd.f32 %v2565_v35, %v2564_v53  ;;  %v2567_v63 = vsel %vm1536_vm3, %v2518_v38, 0.0  ;;  %v2095_v58 = vadd.f32 %v3030_v11, %v2094_v61 }
 0x43c   : > { %v3032_v45 = vpop.eup %3031  ;;  %v2393_v5 = vadd.s32 %v3731_v19, %v2360_v41 }
 0x43d   : > { %v2568_v50 = vadd.f32 %v2567_v63, %v2566_v42  ;;  %v2099_v29 = vsel %vm2098_vm11, %v3030_v11, %v2095_v58  ;;  %v2106_v26 = vmul.f32 %v3032_v45, %v1791_v14  ;;  %vm2111_vm14 = vweird.f32 %v3032_v45 }
 0x43e   : > { %v2104_v43 = vsel %vm2101_vm12, %v2103_v40, %v2099_v29  ;;  %v1794_v9 = vpop.xlane.xlu2 %1793  ;;  %vm2112_vm0 = vmor %vm2110_vm15, %vm2111_vm14  ;;  %vm2425_vm8 = vcmp.lt.s32.totalorder %v2393_v5, 1000 }
 0x43f   : > { %v2292_v24 = vmul.f32 %v3778_v60, %v2104_v43  ;;  %v2107_v21 = vsub.f32 1.0, %v2106_v26  ;;  %3033 = vrcp.f32 %v1794_v9  ;;  %v2130_v11 = vand.u32 2147483648, %v1794_v9 }
 0x440   : > { %v2128_v31 = vand.u32 2147483647, %v1794_v9  ;;  %vm2124_vm5 = vweird.f32 %v1794_v9 }
 0x441   : > { %2324 = vst.msk [vmem:[%s3747_s17 + $0x98] sm:$0xff] %vm1536_vm3, %v2292_v24  ;;  %v2519_v0 = vsel %vm2423_vm13, %v2292_v24, 0.0  ;;  %v2108_v56 = vmul.f32 %v3032_v45, %v2107_v21 }
 0x442   : > { %v2569_v30 = vsel %vm1536_vm3, %v2519_v0, 0.0  ;;  %vm2129_vm7 = vcmp.eq.f32.partialorder %v2128_v31, 8.507059e+37 }
 0x443   : > { %v2570_v4 = vadd.f32 %v2569_v30, %v2568_v50  ;;  %v2109_v20 = vadd.f32 %v3032_v45, %v2108_v56 }
 0x445   : > { %v3034_v60 = vpop.eup %3033  ;;  %v2113_v18 = vsel %vm2112_vm0, %v3032_v45, %v2109_v20 }
 0x446   : > { %v1797_v2 = vpop.xlane.xlu0 %1796  ;;  %v2118_v57 = vsel %vm2115_vm1, %v2117_v36, %v2113_v18  ;;  %v2120_v16 = vmul.f32 %v3034_v60, %v1794_v9  ;;  %vm2125_vm4 = vweird.f32 %v3034_v60 }
 0x447   : > { %3035 = vrcp.f32 %v1797_v2  ;;  %v2293_v49 = vmul.f32 %v3801_v1, %v2118_v57  ;;  %vm2126_vm6 = vmor %vm2124_vm5, %vm2125_vm4  ;;  %v2131_v1 = vor.u32 1.1754944e-38, %v2130_v11  ;;  %v2144_v44 = vand.u32 2147483648, %v1797_v2 }
 0x448   : > { %v2121_v17 = vsub.f32 1.0, %v2120_v16  ;;  %v2142_v38 = vand.u32 2147483647, %v1797_v2  ;;  %vm2138_vm10 = vweird.f32 %v1797_v2 }
 0x449   : > { %2325 = vst.msk [vmem:[%s3747_s17 + $0xa0] sm:$0xff] %vm1536_vm3, %v2293_v49  ;;  %v2520_v59 = vsel %vm2424_vm2, %v2293_v49, 0.0  ;;  %v2145_v58 = vor.u32 1.1754944e-38, %v2144_v44 }
 0x44a   : > { %v2571_v10 = vsel %vm1536_vm3, %v2520_v59, 0.0  ;;  %v2122_v14 = vmul.f32 %v3034_v60, %v2121_v17  ;;  %vm2143_vm12 = vcmp.eq.f32.partialorder %v2142_v38, 8.507059e+37 }
 0x44b   : > { %v2572_v55 = vadd.f32 %v2571_v10, %v2570_v4 }
 0x44c   : > { %v2123_v27 = vadd.f32 %v3034_v60, %v2122_v14 }
 0x44d   : > { %v3036_v12 = vpop.eup %3035  ;;  %v1800_v6 = vpop.xlane.xlu1 %1799 }
 0x44e   : > { %v2134_v62 = vmul.f32 %v3036_v12, %v1797_v2  ;;  %v2127_v53 = vsel %vm2126_vm6, %v3034_v60, %v2123_v27  ;;  %3037 = vrcp.f32 %v1800_v6  ;;  %vm2139_vm9 = vweird.f32 %v3036_v12 }
 0x44f   : > { %v2132_v46 = vsel %vm2129_vm7, %v2131_v1, %v2127_v53  ;;  %vm2140_vm11 = vmor %vm2138_vm10, %vm2139_vm9  ;;  %v2158_v33 = vand.u32 2147483648, %v1800_v6  ;;  %v2156_v24 = vand.u32 2147483647, %v1800_v6  ;;  %vm2152_vm14 = vweird.f32 %v1800_v6 }
 0x450   : > { %v2135_v47 = vsub.f32 1.0, %v2134_v62  ;;  %v2294_v35 = vmul.f32 %v3821_v22, %v2132_v46 }
 0x451   : > { %v2159_v0 = vor.u32 1.1754944e-38, %v2158_v33  ;;  %vm2157_vm0 = vcmp.eq.f32.partialorder %v2156_v24, 8.507059e+37 }
 0x452   : > { %v2136_v32 = vmul.f32 %v3036_v12, %v2135_v47  ;;  %2326 = vst.msk [vmem:[%s3747_s17 + $0xa8] sm:$0xff] %vm1536_vm3, %v2294_v35  ;;  %v2521_v42 = vsel %vm2425_vm8, %v2294_v35, 0.0 }
 0x453   : > { %v2573_v61 = vsel %vm1536_vm3, %v2521_v42, 0.0 }
 0x454   : > { %v2137_v63 = vadd.f32 %v3036_v12, %v2136_v32  ;;  %v3038_v25 = vpop.eup %3037  ;;  %v4100_v50 = vadd.f32 %v2573_v61, %v2572_v55 }
 0x455   : > { %v2148_v22 = vmul.f32 %v3038_v25, %v1800_v6  ;;  %v1803_v40 = vpop.xlane.xlu2 %1802  ;;  %vm2153_vm13 = vweird.f32 %v3038_v25 }
 0x456   : > { %v2141_v45 = vsel %vm2140_vm11, %v3036_v12, %v2137_v63  ;;  %3039 = vrcp.f32 %v1803_v40  ;;  %vm2154_vm15 = vmor %vm2152_vm14, %vm2153_vm13  ;;  %v2172_v20 = vand.u32 2147483648, %v1803_v40  ;;  %v2170_v60 = vand.u32 2147483647, %v1803_v40 }
 0x457   : > { %v2146_v29 = vsel %vm2143_vm12, %v2145_v58, %v2141_v45  ;;  %v2149_v43 = vsub.f32 1.0, %v2148_v22  ;;  %vm2166_vm2 = vweird.f32 %v1803_v40 }
 0x458   : > { %v4103_v26 = vmul.f32 %v3837_v3, %v2146_v29  ;;  %v2173_v57 = vor.u32 1.1754944e-38, %v2172_v20  ;;  %vm2171_vm5 = vcmp.eq.f32.partialorder %v2170_v60, 8.507059e+37 }
 0x459   : > { %v2150_v9 = vmul.f32 %v3038_v25, %v2149_v43 }
 0x45a   : > { %2327 = vst.msk [vmem:[%s3747_s17 + $0xb0] sm:$0xff] %vm1536_vm3, %v4103_v26 }
 0x45b   : > { %v2151_v21 = vadd.f32 %v3038_v25, %v2150_v9 }
 0x45c   : > { %v3040_v48 = vpop.eup %3039 }
 0x45d   : > { %v1806_v56 = vpop.xlane.xlu0 %1805  ;;  %v2155_v51 = vsel %vm2154_vm15, %v3038_v25, %v2151_v21  ;;  %v2162_v30 = vmul.f32 %v3040_v48, %v1803_v40  ;;  %vm2167_vm1 = vweird.f32 %v3040_v48 }
 0x45e   : > { %3041 = vrcp.f32 %v1806_v56  ;;  %v2160_v3 = vsel %vm2157_vm0, %v2159_v0, %v2155_v51  ;;  %vm2168_vm4 = vmor %vm2166_vm2, %vm2167_vm1  ;;  %v2186_v11 = vand.u32 2147483648, %v1806_v56  ;;  %v2184_v14 = vand.u32 2147483647, %v1806_v56 }
 0x45f   : > { %v4109_v28 = vmul.f32 %v3860_v37, %v2160_v3  ;;  %v2163_v4 = vsub.f32 1.0, %v2162_v30  ;;  %vm2180_vm7 = vweird.f32 %v1806_v56 }
 0x460   : > { %v2187_v5 = vor.u32 1.1754944e-38, %v2186_v11  ;;  %vm2185_vm9 = vcmp.eq.f32.partialorder %v2184_v14, 8.507059e+37  ;;  %v2363_v11 = vadd.s32 192, %v3726_v8 }
 0x461   : > { %2328 = vst.msk [vmem:[%s3747_s17 + $0xb8] sm:$0xff] %vm1536_vm3, %v4109_v28  ;;  %v2164_v36 = vmul.f32 %v3040_v48, %v2163_v4  ;;  %v2361_v4 = vadd.s32 176, %v3726_v8 }
 0x463   : > { %v2165_v2 = vadd.f32 %v3040_v48, %v2164_v36 }
 0x464   : > { %v3042_v18 = vpop.eup %3041 }
 0x465   : > { %v2176_v16 = vmul.f32 %v3042_v18, %v1806_v56  ;;  %v1809_v49 = vpop.xlane.xlu1 %1808  ;;  %v2169_v41 = vsel %vm2168_vm4, %v3040_v48, %v2165_v2  ;;  %vm2181_vm6 = vweird.f32 %v3042_v18 }
 0x466   : > { %3043 = vrcp.f32 %v1809_v49  ;;  %v2174_v37 = vsel %vm2171_vm5, %v2173_v57, %v2169_v41  ;;  %vm2182_vm8 = vmor %vm2180_vm7, %vm2181_vm6  ;;  %v2200_v53 = vand.u32 2147483648, %v1809_v49  ;;  %v2198_v47 = vand.u32 2147483647, %v1809_v49 }
 0x467   : > { %v2177_v17 = vsub.f32 1.0, %v2176_v16  ;;  %v4115_v59 = vmul.f32 %v3872_v7, %v2174_v37  ;;  %vm2194_vm11 = vweird.f32 %v1809_v49  ;;  %v2394_v16 = vadd.s32 %v3731_v19, %v2361_v4 }
 0x468   : > { %v2201_v32 = vor.u32 1.1754944e-38, %v2200_v53  ;;  %vm2199_vm13 = vcmp.eq.f32.partialorder %v2198_v47, 8.507059e+37  ;;  %v2362_v41 = vadd.s32 184, %v3726_v8 }
 0x469   : > { %v2178_v10 = vmul.f32 %v3042_v18, %v2177_v17  ;;  %2329 = vst.msk [vmem:[%s3747_s17 + $0xc0] sm:$0xff] %vm1536_vm3, %v4115_v59 }
 0x46b   : > { %v2179_v31 = vadd.f32 %v3042_v18, %v2178_v10 }
 0x46c   : > { %v3044_v55 = vpop.eup %3043 }
 0x46d   : > { %v1812_v12 = vpop.xlane.xlu2 %1811  ;;  %v2183_v27 = vsel %vm2182_vm8, %v3042_v18, %v2179_v31  ;;  %v2190_v1 = vmul.f32 %v3044_v55, %v1809_v49  ;;  %vm2195_vm10 = vweird.f32 %v3044_v55  ;;  %v2395_v31 = vadd.s32 %v3731_v19, %v2362_v41 }
 0x46e   : > { %3045 = vrcp.f32 %v1812_v12  ;;  %v2188_v7 = vsel %vm2185_vm9, %v2187_v5, %v2183_v27  ;;  %vm2196_vm12 = vmor %vm2194_vm11, %vm2195_vm10  ;;  %v2214_v58 = vand.u32 2147483648, %v1812_v12  ;;  %v2212_v22 = vand.u32 2147483647, %v1812_v12 }
 0x46f   : > { %v4121_v62 = vmul.f32 %v3881_v39, %v2188_v7  ;;  %v2191_v6 = vsub.f32 1.0, %v2190_v1  ;;  %vm2208_vm15 = vweird.f32 %v1812_v12  ;;  %vm2426_vm9 = vcmp.lt.s32.totalorder %v2394_v16, 1000 }
 0x470   : > { %v2215_v43 = vor.u32 1.1754944e-38, %v2214_v58  ;;  %vm2213_vm1 = vcmp.eq.f32.partialorder %v2212_v22, 8.507059e+37  ;;  %v2396_v1 = vadd.s32 %v3731_v19, %v2363_v11  ;;  %v2365_v7 = vadd.s32 208, %v3726_v8 }
 0x471   : > { %2330 = vst.msk [vmem:[%s3747_s17 + $0xc8] sm:$0xff] %vm1536_vm3, %v4121_v62  ;;  %v2192_v46 = vmul.f32 %v3044_v55, %v2191_v6  ;;  %v2522_v53 = vsel %vm2426_vm9, %v4103_v26, 0.0  ;;  %v2367_v26 = vadd.s32 224, %v3726_v8  ;;  %v2368_v58 = vadd.s32 232, %v3726_v8 }
 0x473   : > { %v2193_v44 = vadd.f32 %v3044_v55, %v2192_v46 }
 0x474   : > { %v3046_v35 = vpop.eup %3045 }
 0x475   : > { %v2204_v38 = vmul.f32 %v3046_v35, %v1812_v12  ;;  %v1815_v42 = vpop.xlane.xlu0 %1814  ;;  %v2197_v61 = vsel %vm2196_vm12, %v3044_v55, %v2193_v44  ;;  %vm2209_vm14 = vweird.f32 %v3046_v35  ;;  %v2364_v55 = vadd.s32 200, %v3726_v8 }
 0x476   : > { %3047 = vrcp.f32 %v1815_v42  ;;  %v2202_v39 = vsel %vm2199_vm13, %v2201_v32, %v2197_v61  ;;  %vm2210_vm0 = vmor %vm2208_vm15, %vm2209_vm14  ;;  %v2228_v0 = vand.u32 2147483648, %v1815_v42  ;;  %v2226_v51 = vand.u32 2147483647, %v1815_v42 }
 0x477   : > { %v2205_v63 = vsub.f32 1.0, %v2204_v38  ;;  %v4127_v25 = vmul.f32 %v3892_v52, %v2202_v39  ;;  %vm2222_vm4 = vweird.f32 %v1815_v42  ;;  %vm2427_vm12 = vcmp.lt.s32.totalorder %v2395_v31, 1000 }
 0x478   : > { %v2229_v20 = vor.u32 1.1754944e-38, %v2228_v0  ;;  %vm2227_vm6 = vcmp.eq.f32.partialorder %v2226_v51, 8.507059e+37  ;;  %v2397_v47 = vadd.s32 %v3731_v19, %v2364_v55  ;;  %vm2428_vm14 = vcmp.lt.s32.totalorder %v2396_v1, 1000 }
 0x479   : > { %v2206_v45 = vmul.f32 %v3046_v35, %v2205_v63  ;;  %2331 = vst.msk [vmem:[%s3747_s17 + $0xd0] sm:$0xff] %vm1536_vm3, %v4127_v25  ;;  %v2398_v61 = vadd.s32 %v3731_v19, %v2365_v7 }
 0x47b   : > { %v2207_v40 = vadd.f32 %v3046_v35, %v2206_v45 }
 0x47c   : > { %v3048_v29 = vpop.eup %3047 }
 0x47d   : > { %v2211_v33 = vsel %vm2210_vm0, %v3046_v35, %v2207_v40  ;;  %v2218_v9 = vmul.f32 %v3048_v29, %v1815_v42  ;;  %v1818_v24 = vpop.xlane.xlu1 %1817  ;;  %vm2223_vm2 = vweird.f32 %v3048_v29  ;;  %v2366_v35 = vadd.s32 216, %v3726_v8 }
 0x47e   : > { %v2216_v21 = vsel %vm2213_vm1, %v2215_v43, %v2211_v33  ;;  %3049 = vrcp.f32 %v1818_v24  ;;  %vm2224_vm5 = vmor %vm2222_vm4, %vm2223_vm2  ;;  %v2242_v49 = vand.u32 2147483648, %v1818_v24  ;;  %v2240_v17 = vand.u32 2147483647, %v1818_v24 }
 0x47f   : > { %v4133_v52 = vmul.f32 %v3902_v13, %v2216_v21  ;;  %v2219_v48 = vsub.f32 1.0, %v2218_v9  ;;  %vm2236_vm8 = vweird.f32 %v1818_v24  ;;  %v2575_v42 = vsel %vm1536_vm3, %v2522_v53, 0.0 }
 0x480   : > { %vm2241_vm11 = vcmp.eq.f32.partialorder %v2240_v17, 8.507059e+37  ;;  %vm2429_vm0 = vcmp.lt.s32.totalorder %v2397_v47, 1000  ;;  %v2399_v63 = vadd.s32 %v3731_v19, %v2366_v35  ;;  %v2524_v40 = vsel %vm2428_vm14, %v4115_v59, 0.0 }
 0x481   : > { %2332 = vst.msk [vmem:[%s3747_s17 + $0xd8] sm:$0xff] %vm1536_vm3, %v4133_v52  ;;  %v2220_v56 = vmul.f32 %v3048_v29, %v2219_v48  ;;  %vm2430_vm4 = vcmp.lt.s32.totalorder %v2398_v61, 1000  ;;  %v2525_v9 = vsel %vm2429_vm0, %v4121_v62, 0.0  ;;  %v2369_v21 = vadd.s32 240, %v3726_v8 }
 0x482   : > { %v2579_v59 = vsel %vm1536_vm3, %v2524_v40, 0.0  ;;  %v2581_v51 = vsel %vm1536_vm3, %v2525_v9, 0.0  ;;  %vm2601_vm14 = vcmask 122880  }
 0x483   : > { %v2221_v30 = vadd.f32 %v3048_v29, %v2220_v56  ;;  %v2526_v56 = vsel %vm2430_vm4, %v4127_v25, 0.0  ;;  %v2370_v25 = vadd.s32 248, %v3726_v8 }
 0x484   : > { %v3050_v3 = vpop.eup %3049  ;;  %v2583_v4 = vsel %vm1536_vm3, %v2526_v56, 0.0 }
 0x485   : > { %v2225_v36 = vsel %vm2224_vm5, %v3048_v29, %v2221_v30  ;;  %v2232_v13 = vmul.f32 %v3050_v3, %v1818_v24  ;;  %v1821_v18 = vpop.xlane.xlu2 %1820  ;;  %vm2237_vm7 = vweird.f32 %v3050_v3  ;;  %v2400_v24 = vadd.s32 %v3731_v19, %v2367_v26 }
 0x486   : > { %v2230_v60 = vsel %vm2227_vm6, %v2229_v20, %v2225_v36  ;;  %3051 = vrcp.f32 %v1821_v18  ;;  %vm2238_vm10 = vmor %vm2236_vm8, %vm2237_vm7  ;;  %v2256_v44 = vand.u32 2147483648, %v1821_v18  ;;  %v2254_v38 = vand.u32 2147483647, %v1821_v18 }
 0x487   : > { %v4140_v2 = vmul.f32 %v3912_v23, %v2230_v60  ;;  %v2233_v57 = vsub.f32 1.0, %v2232_v13  ;;  %v2243_v23 = vor.u32 1.1754944e-38, %v2242_v49  ;;  %vm2250_vm15 = vweird.f32 %v1821_v18 }
 0x488   : > { %v2257_v45 = vor.u32 1.1754944e-38, %v2256_v44  ;;  %vm2255_vm2 = vcmp.eq.f32.partialorder %v2254_v38, 8.507059e+37  ;;  %vm2431_vm5 = vcmp.lt.s32.totalorder %v2399_v63, 1000  ;;  %vm2432_vm6 = vcmp.lt.s32.totalorder %v2400_v24, 1000 }
 0x489   : > { %2333 = vst.msk [vmem:[%s3747_s17 + $0xe0] sm:$0xff] %vm1536_vm3, %v4140_v2  ;;  %v2234_v37 = vmul.f32 %v3050_v3, %v2233_v57  ;;  %v2528_v13 = vsel %vm2432_vm6, %v4140_v2, 0.0 }
 0x48a   : > { %v2587_v17 = vsel %vm1536_vm3, %v2528_v13, 0.0 }
 0x48b   : > { %v2235_v10 = vadd.f32 %v3050_v3, %v2234_v37 }
 0x48c   : > { %v3052_v14 = vpop.eup %3051 }
 0x48d   : > { %v2239_v5 = vsel %vm2238_vm10, %v3050_v3, %v2235_v10  ;;  %v2246_v27 = vmul.f32 %v3052_v14, %v1821_v18  ;;  %vm2251_vm13 = vweird.f32 %v3052_v14  ;;  %v2402_v3 = vadd.s32 %v3731_v19, %v2369_v21 }
 0x48e   : > { %v2244_v12 = vsel %vm2241_vm11, %v2243_v23, %v2239_v5  ;;  %vm2252_vm1 = vmor %vm2250_vm15, %vm2251_vm13 }
 0x48f   : > { %v2302_v6 = vmul.f32 %v3917_v34, %v2244_v12  ;;  %v2247_v46 = vsub.f32 1.0, %v2246_v27  ;;  %v2523_v34 = vsel %vm2427_vm12, %v4109_v28, 0.0  ;;  %v2576_v28 = vadd.f32 %v2575_v42, %v4100_v50 }
 0x490   : > { %v2577_v43 = vsel %vm1536_vm3, %v2523_v34, 0.0  ;;  %v2401_v50 = vadd.s32 %v3731_v19, %v2368_v58  ;;  %vm2434_vm8 = vcmp.lt.s32.totalorder %v2402_v3, 1000 }
 0x491   : > { %2334 = vst.msk [vmem:[%s3747_s17 + $0xe8] sm:$0xff] %vm1536_vm3, %v2302_v6  ;;  %v2248_v32 = vmul.f32 %v3052_v14, %v2247_v46  ;;  %v2578_v0 = vadd.f32 %v2577_v43, %v2576_v28 }
 0x492   : > { %vm2433_vm7 = vcmp.lt.s32.totalorder %v2401_v50, 1000 }
 0x493   : > { %v2249_v39 = vadd.f32 %v3052_v14, %v2248_v32  ;;  %v2580_v62 = vadd.f32 %v2579_v59, %v2578_v0  ;;  %v2529_v49 = vsel %vm2433_vm7, %v2302_v6, 0.0 }
 0x494   : > { %v1824_v22 = vpop.xlane.xlu0 %1823  ;;  %v2589_v2 = vsel %vm1536_vm3, %v2529_v49, 0.0 }
 0x495   : > { %v2253_v29 = vsel %vm2252_vm1, %v3052_v14, %v2249_v39  ;;  %3053 = vrcp.f32 %v1824_v22  ;;  %v2582_v36 = vadd.f32 %v2581_v51, %v2580_v62  ;;  %v2270_v16 = vand.u32 2147483648, %v1824_v22 }
 0x496   : > { %v2258_v33 = vsel %vm2255_vm2, %v2257_v45, %v2253_v29  ;;  %v2268_v37 = vand.u32 2147483647, %v1824_v22  ;;  %vm2264_vm10 = vweird.f32 %v1824_v22 }
 0x497   : > { %v2303_v48 = vmul.f32 %v3925_v54, %v2258_v33  ;;  %v2527_v54 = vsel %vm2431_vm5, %v4133_v52, 0.0  ;;  %v2584_v18 = vadd.f32 %v2583_v4, %v2582_v36  ;;  %v2403_v52 = vadd.s32 %v3731_v19, %v2370_v25 }
 0x498   : > { %v2585_v57 = vsel %vm1536_vm3, %v2527_v54, 0.0  ;;  %v2271_v23 = vor.u32 1.1754944e-38, %v2270_v16  ;;  %vm2269_vm12 = vcmp.eq.f32.partialorder %v2268_v37, 8.507059e+37 }
 0x499   : > { %2335 = vst.msk [vmem:[%s3747_s17 + $0xf0] sm:$0xff] %vm1536_vm3, %v2303_v48  ;;  %v2586_v11 = vadd.f32 %v2585_v57, %v2584_v18  ;;  %v2530_v10 = vsel %vm2434_vm8, %v2303_v48, 0.0  ;;  %vm2435_vm13 = vcmp.lt.s32.totalorder %v2403_v52, 1000 }
 0x49a   : > { %v2591_v55 = vsel %vm1536_vm3, %v2530_v10, 0.0 }
 0x49b   : > { %v3054_v30 = vpop.eup %3053  ;;  %v2588_v14 = vadd.f32 %v2587_v17, %v2586_v11 }
 0x49c   : > { %v2260_v20 = vmul.f32 %v3054_v30, %v1824_v22  ;;  %vm2265_vm9 = vweird.f32 %v3054_v30 }
 0x49d   : > { %vm2266_vm11 = vmor %vm2264_vm10, %vm2265_vm9  ;;  %v2590_v12 = vadd.f32 %v2589_v2, %v2588_v14 }
 0x49e   : > { %v2261_v60 = vsub.f32 1.0, %v2260_v20 }
 0x49f   : > { %v2592_v27 = vadd.f32 %v2591_v55, %v2590_v12 }
 0x4a0   : > { %v2262_v41 = vmul.f32 %v3054_v30, %v2261_v60 }
 0x4a2   : > { %v2263_v8 = vadd.f32 %v3054_v30, %v2262_v41 }
 0x4a4   : > { %v2267_v31 = vsel %vm2266_vm11, %v3054_v30, %v2263_v8 }
 0x4a5   : > { %v2272_v5 = vsel %vm2269_vm12, %v2271_v23, %v2267_v31 }
 0x4a6   : > { %v2304_v19 = vmul.f32 %v3957_v15, %v2272_v5 }
 0x4a8   : > { %2336 = vst.msk [vmem:[%s3747_s17 + $0xf8] sm:$0xff] %vm1536_vm3, %v2304_v19  ;;  %v2531_v1 = vsel %vm2435_vm13, %v2304_v19, 0.0 }
 0x4a9   : > { %v2593_v7 = vsel %vm1536_vm3, %v2531_v1, 0.0 }
 0x4aa   : > { %v2594_v6 = vadd.f32 %v2593_v7, %v2592_v27 }
 0x4ac   : > { %v2595_v53 = vrot.slane %v2594_v6, 4 }
 0x4ae   : > { %v2596_v46 = vadd.f32 %v2595_v53, %v2594_v6 }
 0x4b0   : > { %v2597_v47 = vrot.slane %v2596_v46, 2 }
 0x4b2   : > { %v2598_v35 = vadd.f32 %v2597_v47, %v2596_v46 }
 0x4b4   : > { %v2599_v15 = vrot.slane %v2598_v35, 1 }
 0x4b6   : > { %v2600_v44 = vadd.f32 %v2599_v15, %v2598_v35 }
 0x4b8   : > { %2602 = vst.msk [vmem:[%s279_s20] sm:$0x1] %vm2601_vm14, %v2600_v44 }
 0x4b9   : > { %3082 = shalt.err (!%p3079_p3)
}
 0x4ba   : > { %2888 = dma.vmem_to_hbm [thread:$0]  (%p3197_p5), %s2624_s21, 16, %s2626_s22, %s2609_s23  }
 0x4bb PF: > { %p2894_p4 = scmp.ge.s32.totalorder %s3117_s27, 2  ;;  %s2645_s15 = sand.u32 1, %s3105_s24  }
 0x4bc   : > { %s2646_s16 = scalar_lea.sflag [#allocation3], %s2645_s15 }
 0x4bd   : > { %p2891_p7 = pnand %p2894_p4, %p3201_p6 }
 0x4bf   : > { %p2892_p8 = pneg %p2891_p7 }
 0x4c1   : > { %3100 = dma.done.wait (%p2892_p8), %s2646_s16, 16  }
 0x4c2   : > { %3102 = vsyncadd (%p2892_p8), %s2646_s16, 4294967280  ;;  %p18_p9 = scmp.ge.s32.totalorder %s3184_s30, 6   ;;  %s4237_s24 = smov %s3109_s25 }
 0x4c3   : > { %s4238_s25 = smov %s3113_s26  ;;  %s4239_s26 = smov %s3195_s10 }
 0x4c4   : > { %s4240_s27 = smov %s3184_s30  ;;  %20 = sbr.rel (!%p18_p9) target bundleno = 3 (0x3), region = 91 }
 0x4c9   :  { %2651 = vsyncpa [#allocation3], 1 }
 0x4ca   :  { %2653 = vsyncpa [#allocation3 + $0x1], 1 }

</bundles_post_ra>
